<compile_context>
chip_gen: v5e
topology: v5e:2x2
jax: 0.10.0
libtpu: 0.0.40
codegen_flags: <defaults>
</compile_context>

<pallas_src>
import functools

import jax
import jax.numpy as jnp
import numpy as np
from jax.experimental import pallas as pl
from jax.experimental.pallas import tpu as pltpu


# ----------------------------------------------------------------------------- kernel
def _postproc_kernel(obj_ref, q_ref, s_ref, out_ref, acc_ref, *, H, W, K, T, dt):
    """One grid step == (batch element n, channel chunk c).

    obj_ref : [1, c_chunk*H, W]      bf16 rows of the NCHW prediction tensor
                                     (channels [c*c_chunk, (c+1)*c_chunk), all H rows)
    q_ref   : [1, 2, Na]             f32 query points, row 0 = x (width), row 1 = y (height)
    s_ref   : [1, 4, Na]             f32 current state (x, y, v, yaw)
    out_ref : [1, 6, K, T, Na]       f32 planes: x, y, v, yaw, acc, yawrate
    acc_ref : [n_chunks, c_chunk, Na] f32 scratch holding the sampled prediction
    """
    c = pl.program_id(1)
    n_chunks = pl.num_programs(1)
    Na = q_ref.shape[-1]
    c_chunk = obj_ref.shape[1] // H

    # ---- bilinear corner weights.  PyTorch's normalize -> grid_sample unnormalize
    # (align_corners=True) is an exact round trip, so pixel coordinates are used
    # directly.  Out-of-range corners match no one-hot column/row and contribute 0
    # (== padding_mode='zeros').
    q = q_ref[0]                                   # [2, Na]
    x = q[0:1, :]                                  # [1, Na] width coordinate
    y = q[1:2, :]                                  # [1, Na] height coordinate
    x0f = jnp.floor(x)
    y0f = jnp.floor(y)
    wx1 = x - x0f
    wx0 = 1.0 - wx1
    wy1 = y - y0f
    wy0 = 1.0 - wy1
    x0 = x0f.astype(jnp.int32)
    x1 = x0 + 1
    y0 = y0f.astype(jnp.int32)
    y1 = y0 + 1

    col = jax.lax.broadcasted_iota(jnp.int32, (W, Na), 0)
    row = jax.lax.broadcasted_iota(jnp.int32, (H, Na), 0)
    wx_oh = jnp.where(col == x0, wx0, 0.0) + jnp.where(col == x1, wx1, 0.0)   # [W, Na]
    wy_oh = jnp.where(row == y0, wy0, 0.0) + jnp.where(row == y1, wy1, 0.0)   # [H, Na]

    # ---- separable sampling: width contraction on the MXU (bf16 x bf16 -> f32),
    # height reduce as a VPU multiply + XLU sublane sum.
    obj = obj_ref[0]                                                    # [c_chunk*H, W] bf16
    s1 = jnp.dot(obj, wx_oh.astype(obj.dtype),
                 preferred_element_type=jnp.float32)                    # [c_chunk*H, Na]
    s2 = (s1.reshape(c_chunk, H, Na) * wy_oh[None, :, :]).sum(axis=1)   # [c_chunk, Na]
    acc_ref[c] = s2

    # ---- finalize on the last channel chunk: unicycle forward dynamics (f32).
    @pl.when(c == n_chunks - 1)
    def _():
        # channel order is (k, t, [acc, yawrate])
        pred = acc_ref[...].reshape(K, T, 2, Na)
        u_acc = pred[:, :, 0, :]                    # [K, T, Na]
        u_yawr = pred[:, :, 1, :]                   # [K, T, Na]

        def psum_t(u):
            # inclusive prefix sum over the T axis; exact f32, log2(T) shifted adds.
            step = 1
            while step < T:
                shifted = jnp.concatenate(
                    [jnp.zeros_like(u[:, :step, :]), u[:, :T - step, :]], axis=1)
                u = u + shifted
                step *= 2
            return u

        s0 = s_ref[0]                               # [4, Na]
        x0s = s0[0:1, :]
        y0s = s0[1:2, :]
        v0 = s0[2:3, :]
        yaw0 = s0[3:4, :]

        v = v0 + dt * psum_t(u_acc)                 # v_t
        yaw = yaw0 + dt * psum_t(u_yawr)            # yaw_t
        pv = v - dt * u_acc                         # v_{t-1}
        pyaw = yaw - dt * u_yawr                    # yaw_{t-1}
        xx = x0s + dt * psum_t(jnp.cos(pyaw) * pv)
        yy = y0s + dt * psum_t(jnp.sin(pyaw) * pv)

        # six direct plane stores -- no jnp.stack relayout before the writeback.
        out_ref[0, 0] = xx
        out_ref[0, 1] = yy
        out_ref[0, 2] = v
        out_ref[0, 3] = yaw
        out_ref[0, 4] = u_acc
        out_ref[0, 5] = u_yawr


# ----------------------------------------------------------------------------- wrapper
def _pick_c_chunk(C, H, W, itemsize, budget_bytes=8 * 2**20):
    """Largest channel-chunk whose [c_chunk*H, W] block fits a per-buffer budget."""
    valid = [c for c in range(1, C + 1)
             if C % c == 0 and ((c * H) % 8 == 0 or c == C)]
    fitting = [c for c in valid if c * H * W * itemsize <= budget_bytes]
    return max(fitting) if fitting else min(valid)


def direct_regression_postprocess(obj_trajectory, query_pts, curr_state, *,
                                  trajectory_candidates, sampling_time,
                                  c_chunk=None):
    """JAX/Pallas equivalent of DirectRegressionPostProcessor.forward (actual_size=None)."""
    N, C, H, W = obj_trajectory.shape
    assert H == W, "module asserts square pixels"
    Na = query_pts.shape[1]
    K = trajectory_candidates
    assert C % (K * 2) == 0
    T = C // (K * 2)
    S = curr_state.shape[-1]
    assert S == 4, "unicycle state is [x, y, v, yaw]"
    dt = float(sampling_time)
    assert dt > 0

    if c_chunk is None:
        c_chunk = _pick_c_chunk(C, H, W, itemsize=2)
    assert C % c_chunk == 0 and ((c_chunk * H) % 8 == 0 or c_chunk == C)
    n_chunks = C // c_chunk

    # NCHW -> [N, C*H, W] is a pure reshape (no HBM transpose of the big tensor);
    # bf16 halves HBM traffic and the double-buffered VMEM block (accumulation f32).
    obj_rows = obj_trajectory.reshape(N, C * H, W).astype(jnp.bfloat16)
    q_t = jnp.transpose(query_pts, (0, 2, 1)).astype(jnp.float32)    # [N, 2, Na]
    s_t = jnp.transpose(curr_state, (0, 2, 1)).astype(jnp.float32)   # [N, S, Na]

    # explicit scoped-VMEM budget (v5e default is only 16 MiB; v7x physical is 64 MiB)
    obj_block_bytes = c_chunk * H * W * 2
    vmem_limit = int(min(64 * 2**20, max(32 * 2**20, 4 * obj_block_bytes + (2 << 20))))

    kernel = functools.partial(_postproc_kernel, H=H, W=W, K=K, T=T, dt=dt)
    out = pl.pallas_call(
        kernel,
        out_shape=jax.ShapeDtypeStruct((N, 6, K, T, Na), jnp.float32),
        grid=(N, n_chunks),                       # batch parallel; chunk (reduction) last
        in_specs=[
            pl.BlockSpec((1, c_chunk * H, W), lambda n, c: (n, c, 0)),
            pl.BlockSpec((1, 2, Na), lambda n, c: (n, 0, 0)),
            pl.BlockSpec((1, S, Na), lambda n, c: (n, 0, 0)),
        ],
        out_specs=pl.BlockSpec((1, 6, K, T, Na), lambda n, c: (n, 0, 0, 0, 0)),
        scratch_shapes=[pltpu.VMEM((n_chunks, c_chunk, Na), jnp.float32)],
        compiler_params=pltpu.CompilerParams(
            dimension_semantics=("parallel", "arbitrary"),
            vmem_limit_bytes=vmem_limit),
    )(obj_rows, q_t, s_t)

    # split the merged slab; pos / yaw are slices of traj (as in the reference).
    comp = jnp.transpose(out, (0, 4, 2, 3, 1)).reshape(N * Na, K, T, 6)
    traj = comp[..., 0:4]
    pos = comp[..., 0:2]
    yaw = comp[..., 3:4]
    input_pred = comp[..., 4:6]
    return traj, pos, yaw, input_pred


# ----------------------------------------------------------------------------- pure-JAX reference
def _reference_forward(obj_nchw, query_pts, curr_state, K, dt):
    N, C, H, W = obj_nchw.shape
    Na = query_pts.shape[1]
    T = C // (K * 2)

    g = query_pts / (W - 1) * 2.0 - 1.0
    x = (g[..., 0] + 1.0) * 0.5 * (W - 1)
    y = (g[..., 1] + 1.0) * 0.5 * (H - 1)
    x0f = jnp.floor(x); y0f = jnp.floor(y)
    wx1 = x - x0f; wx0 = 1.0 - wx1
    wy1 = y - y0f; wy0 = 1.0 - wy1
    x0 = x0f.astype(jnp.int32); x1 = x0 + 1
    y0 = y0f.astype(jnp.int32); y1 = y0 + 1

    flat = obj_nchw.reshape(N, C, H * W)

    def gather(xi, yi):
        valid = (xi >= 0) & (xi < W) & (yi >= 0) & (yi < H)
        xc = jnp.clip(xi, 0, W - 1)
        yc = jnp.clip(yi, 0, H - 1)
        idx = (yc * W + xc)[:, None, :]                      # [N,1,Na]
        v = jnp.take_along_axis(flat, idx, axis=2)           # [N,C,Na]
        return jnp.where(valid[:, None, :], v, 0.0)

    pred = (gather(x0, y0) * (wx0 * wy0)[:, None, :]
            + gather(x1, y0) * (wx1 * wy0)[:, None, :]
            + gather(x0, y1) * (wx0 * wy1)[:, None, :]
            + gather(x1, y1) * (wx1 * wy1)[:, None, :])      # [N,C,Na]
    pred = jnp.transpose(pred, (0, 2, 1))                    # [N,Na,C]
    input_pred = pred.reshape(N * Na, K, T, 2)

    state = jnp.repeat(curr_state.reshape(N * Na, 1, -1), K, axis=1)   # [N*Na,K,4]
    traj_list = []
    for t in range(T):
        u = input_pred[:, :, t, :]
        theta = state[..., 3:4]
        vel = state[..., 2:3]
        dxdt = jnp.concatenate([jnp.cos(theta) * vel, jnp.sin(theta) * vel, u], axis=-1)
        state = state + dxdt * dt
        traj_list.append(state)
    traj = jnp.stack(traj_list, axis=2)                      # [N*Na,K,T,4]
    return traj, traj[..., 0:2], traj[..., 3:4], input_pred


# ----------------------------------------------------------------------------- main
if __name__ == "__main__":
    # small shapes consistent with the module
    N, Na = 2, 8                 # batch, agents
    H = W = 16                   # image resolution
    K = 2                        # trajectory candidates
    T = 4                        # prediction horizon  -> C = K * T * 2
    C = K * T * 2
    dt = 0.1

    key = jax.random.PRNGKey(0)
    k1, k2, k3, k4, k5 = jax.random.split(key, 5)

    obj_trajectory = jax.random.normal(k1, (N, C, H, W), dtype=jnp.float32) * 0.1
    query_pts = jax.random.uniform(k2, (N, Na, 2), dtype=jnp.float32) * (W - 1)
    pos0 = jax.random.normal(k3, (N, Na, 2), dtype=jnp.float32) * 5.0
    vel0 = jax.random.uniform(k4, (N, Na, 1), dtype=jnp.float32) * 5.0
    yaw0 = (jax.random.uniform(k5, (N, Na, 1), dtype=jnp.float32) - 0.5) * 2.0 * np.pi
    curr_state = jnp.concatenate([pos0, vel0, yaw0], axis=-1)   # [N, Na, 4]

    # c_chunk=8 (< C=16) deliberately exercises the multi-chunk / VMEM-bounded path.
    traj, pos, yaw, input_pred = direct_regression_postprocess(
        obj_trajectory, query_pts, curr_state,
        trajectory_candidates=K, sampling_time=dt, c_chunk=8)
    jax.block_until_ready((traj, pos, yaw, input_pred))

    traj_r, pos_r, yaw_r, pred_r = _reference_forward(
        obj_trajectory, query_pts, curr_state, K, dt)

    # NOTE: the sampling matmul runs bf16 x bf16 -> f32 on the MXU (per the perf
    # review), so tolerances are bf16-class; the unicycle integration itself is
    # exact f32 (prefix sums), so no additional error accumulates over T.
    tol = dict(rtol=1e-2, atol=5e-3)
    np.testing.assert_allclose(np.asarray(input_pred), np.asarray(pred_r), **tol)
    np.testing.assert_allclose(np.asarray(traj), np.asarray(traj_r), **tol)
    np.testing.assert_allclose(np.asarray(pos), np.asarray(pos_r), **tol)
    np.testing.assert_allclose(np.asarray(yaw), np.asarray(yaw_r), **tol)

    print("KERNEL_OK")
</pallas_src>

<mosaic_0001>
module attributes {stable_mosaic.version = 11 : i64} {
  func.func @_postproc_kernel(%arg0: i32, %arg1: i32, %arg2: memref<1x128x16xbf16, #tpu.memory_space<vmem>>, %arg3: memref<1x2x8xf32, #tpu.memory_space<vmem>>, %arg4: memref<1x4x8xf32, #tpu.memory_space<vmem>>, %arg5: memref<1x6x2x4x8xf32, #tpu.memory_space<vmem>>, %arg6: memref<2x8x8xf32, #tpu.memory_space<vmem>>) attributes {dimension_semantics = [#tpu.dimension_semantics<parallel>, #tpu.dimension_semantics<arbitrary>], iteration_bounds = array<i64: 2, 2>, scalar_prefetch = 0 : i64, scratch_operands = 1 : i64, tpu.core_type = #tpu.core_type<tc>, window_params = [{transform_indices = @transform_0, window_bounds = array<i64: 1, 128, 16>}, {transform_indices = @transform_1, window_bounds = array<i64: 1, 2, 8>}, {transform_indices = @transform_2, window_bounds = array<i64: 1, 4, 8>}, {transform_indices = @transform_3, window_bounds = array<i64: 1, 6, 2, 4, 8>}]} {
    %c0 = arith.constant 0 : index
    %c0_0 = arith.constant 0 : index
    %c0_1 = arith.constant 0 : index
    %0 = vector.load %arg3[%c0, %c0_0, %c0_1] : memref<1x2x8xf32, #tpu.memory_space<vmem>>, vector<1x2x8xf32>
    %1 = vector.shape_cast %0 : vector<1x2x8xf32> to vector<2x8xf32>
    %2 = vector.extract_strided_slice %1 {offsets = [0, 0], sizes = [1, 8], strides = [1, 1]} : vector<2x8xf32> to vector<1x8xf32>
    %3 = vector.extract_strided_slice %1 {offsets = [1, 0], sizes = [1, 8], strides = [1, 1]} : vector<2x8xf32> to vector<1x8xf32>
    %4 = math.floor %2 : vector<1x8xf32>
    %5 = math.floor %3 : vector<1x8xf32>
    %6 = arith.subf %2, %4 : vector<1x8xf32>
    %cst = arith.constant 1.000000e+00 : f32
    %7 = vector.broadcast %cst : f32 to vector<1x8xf32>
    %8 = arith.subf %7, %6 : vector<1x8xf32>
    %9 = arith.subf %3, %5 : vector<1x8xf32>
    %cst_2 = arith.constant 1.000000e+00 : f32
    %10 = vector.broadcast %cst_2 : f32 to vector<1x8xf32>
    %11 = arith.subf %10, %9 : vector<1x8xf32>
    %12 = arith.fptosi %4 : vector<1x8xf32> to vector<1x8xi32>
    %c1_i32 = arith.constant 1 : i32
    %13 = vector.broadcast %c1_i32 : i32 to vector<1x8xi32>
    %14 = arith.addi %12, %13 : vector<1x8xi32>
    %15 = arith.fptosi %5 : vector<1x8xf32> to vector<1x8xi32>
    %c1_i32_3 = arith.constant 1 : i32
    %16 = vector.broadcast %c1_i32_3 : i32 to vector<1x8xi32>
    %17 = arith.addi %15, %16 : vector<1x8xi32>
    %18 = tpu.iota {dimensions = array<i32: 0>} : vector<16x8xi32>
    %19 = tpu.iota {dimensions = array<i32: 0>} : vector<16x8xi32>
    %20 = vector.broadcast %12 : vector<1x8xi32> to vector<16x8xi32>
    %21 = arith.cmpi eq, %18, %20 : vector<16x8xi32>
    %cst_4 = arith.constant 0.000000e+00 : f32
    %22 = vector.shape_cast %8 : vector<1x8xf32> to vector<1x8xf32>
    %23 = vector.broadcast %22 : vector<1x8xf32> to vector<16x8xf32>
    %24 = vector.broadcast %cst_4 : f32 to vector<16x8xf32>
    %25 = arith.select %21, %23, %24 : vector<16x8xi1>, vector<16x8xf32>
    %26 = vector.broadcast %14 : vector<1x8xi32> to vector<16x8xi32>
    %27 = arith.cmpi eq, %18, %26 : vector<16x8xi32>
    %cst_5 = arith.constant 0.000000e+00 : f32
    %28 = vector.shape_cast %6 : vector<1x8xf32> to vector<1x8xf32>
    %29 = vector.broadcast %28 : vector<1x8xf32> to vector<16x8xf32>
    %30 = vector.broadcast %cst_5 : f32 to vector<16x8xf32>
    %31 = arith.select %27, %29, %30 : vector<16x8xi1>, vector<16x8xf32>
    %32 = arith.addf %25, %31 : vector<16x8xf32>
    %33 = vector.broadcast %15 : vector<1x8xi32> to vector<16x8xi32>
    %34 = arith.cmpi eq, %19, %33 : vector<16x8xi32>
    %cst_6 = arith.constant 0.000000e+00 : f32
    %35 = vector.shape_cast %11 : vector<1x8xf32> to vector<1x8xf32>
    %36 = vector.broadcast %35 : vector<1x8xf32> to vector<16x8xf32>
    %37 = vector.broadcast %cst_6 : f32 to vector<16x8xf32>
    %38 = arith.select %34, %36, %37 : vector<16x8xi1>, vector<16x8xf32>
    %39 = vector.broadcast %17 : vector<1x8xi32> to vector<16x8xi32>
    %40 = arith.cmpi eq, %19, %39 : vector<16x8xi32>
    %cst_7 = arith.constant 0.000000e+00 : f32
    %41 = vector.shape_cast %9 : vector<1x8xf32> to vector<1x8xf32>
    %42 = vector.broadcast %41 : vector<1x8xf32> to vector<16x8xf32>
    %43 = vector.broadcast %cst_7 : f32 to vector<16x8xf32>
    %44 = arith.select %40, %42, %43 : vector<16x8xi1>, vector<16x8xf32>
    %45 = arith.addf %38, %44 : vector<16x8xf32>
    %c0_8 = arith.constant 0 : index
    %c0_9 = arith.constant 0 : index
    %c0_10 = arith.constant 0 : index
    %46 = vector.load %arg2[%c0_8, %c0_9, %c0_10] : memref<1x128x16xbf16, #tpu.memory_space<vmem>>, vector<1x128x16xbf16>
    %47 = vector.shape_cast %46 : vector<1x128x16xbf16> to vector<128x16xbf16>
    %48 = arith.truncf %32 : vector<16x8xf32> to vector<16x8xbf16>
    %cst_11 = arith.constant dense<0.000000e+00> : vector<128x8xf32>
    %49 = tpu.matmul %47, %48, %cst_11 {dimension_numbers = #tpu.dot_dimension_numbers<[1], [0], [0], [1], [0, 0, 1, 1], [], []>} : vector<128x16xbf16>, vector<16x8xbf16>, vector<128x8xf32> -> vector<128x8xf32>
    %50 = vector.shape_cast %49 : vector<128x8xf32> to vector<8x16x8xf32>
    %51 = vector.shape_cast %45 : vector<16x8xf32> to vector<1x16x8xf32>
    %52 = vector.broadcast %51 : vector<1x16x8xf32> to vector<8x16x8xf32>
    %53 = arith.mulf %50, %52 : vector<8x16x8xf32>
    %cst_12 = arith.constant dense<0.000000e+00> : vector<8x8xf32>
    %54 = vector.multi_reduction <add>, %53, %cst_12 [1] : vector<8x16x8xf32> to vector<8x8xf32>
    %55 = arith.index_cast %arg1 : i32 to index
    %c0_13 = arith.constant 0 : index
    %c0_14 = arith.constant 0 : index
    %56 = vector.load %arg6[%55, %c0_13, %c0_14] : memref<2x8x8xf32, #tpu.memory_space<vmem>>, vector<1x8x8xf32>
    %57 = vector.shape_cast %56 : vector<1x8x8xf32> to vector<8x8xf32>
    %58 = vector.shape_cast %54 : vector<8x8xf32> to vector<1x8x8xf32>
    tpu.vector_store %arg6[%55, %c0_13, %c0_14], %58 {strides = array<i32>} : memref<2x8x8xf32, #tpu.memory_space<vmem>>, vector<1x8x8xf32>,
    %c1_i32_15 = arith.constant 1 : i32
    %59 = arith.cmpi eq, %arg1, %c1_i32_15 : i32
    %60 = arith.extui %59 : i1 to i32
    %c0_i32 = arith.constant 0 : i32
    %61 = arith.cmpi ne, %60, %c0_i32 : i32
    scf.if %61 {
      %c0_16 = arith.constant 0 : index
      %c0_17 = arith.constant 0 : index
      %c0_18 = arith.constant 0 : index
      %62 = vector.load %arg6[%c0_16, %c0_17, %c0_18] : memref<2x8x8xf32, #tpu.memory_space<vmem>>, vector<2x8x8xf32>
      %63 = vector.shape_cast %62 : vector<2x8x8xf32> to vector<2x4x2x8xf32>
      %64 = vector.extract_strided_slice %63 {offsets = [0, 0, 0, 0], sizes = [2, 4, 1, 8], strides = [1, 1, 1, 1]} : vector<2x4x2x8xf32> to vector<2x4x1x8xf32>
      %65 = vector.shape_cast %64 : vector<2x4x1x8xf32> to vector<2x4x8xf32>
      %66 = vector.extract_strided_slice %63 {offsets = [0, 0, 1, 0], sizes = [2, 4, 1, 8], strides = [1, 1, 1, 1]} : vector<2x4x2x8xf32> to vector<2x4x1x8xf32>
      %67 = vector.shape_cast %66 : vector<2x4x1x8xf32> to vector<2x4x8xf32>
      %c0_19 = arith.constant 0 : index
      %c0_20 = arith.constant 0 : index
      %c0_21 = arith.constant 0 : index
      %68 = vector.load %arg4[%c0_19, %c0_20, %c0_21] : memref<1x4x8xf32, #tpu.memory_space<vmem>>, vector<1x4x8xf32>
      %69 = vector.shape_cast %68 : vector<1x4x8xf32> to vector<4x8xf32>
      %70 = vector.extract_strided_slice %69 {offsets = [0, 0], sizes = [1, 8], strides = [1, 1]} : vector<4x8xf32> to vector<1x8xf32>
      %71 = vector.extract_strided_slice %69 {offsets = [1, 0], sizes = [1, 8], strides = [1, 1]} : vector<4x8xf32> to vector<1x8xf32>
      %72 = vector.extract_strided_slice %69 {offsets = [2, 0], sizes = [1, 8], strides = [1, 1]} : vector<4x8xf32> to vector<1x8xf32>
      %73 = vector.extract_strided_slice %69 {offsets = [3, 0], sizes = [1, 8], strides = [1, 1]} : vector<4x8xf32> to vector<1x8xf32>
      %cst_22 = arith.constant 0.000000e+00 : f32
      %74 = vector.broadcast %cst_22 : f32 to vector<2x1x8xf32>
      %75 = vector.extract_strided_slice %65 {offsets = [0, 0, 0], sizes = [2, 3, 8], strides = [1, 1, 1]} : vector<2x4x8xf32> to vector<2x3x8xf32>
      %76 = tpu.concatenate %74, %75 in 1 : vector<2x1x8xf32>, vector<2x3x8xf32> -> vector<2x4x8xf32>
      %77 = arith.addf %65, %76 : vector<2x4x8xf32>
      %cst_23 = arith.constant 0.000000e+00 : f32
      %78 = vector.broadcast %cst_23 : f32 to vector<2x2x8xf32>
      %79 = vector.extract_strided_slice %77 {offsets = [0, 0, 0], sizes = [2, 2, 8], strides = [1, 1, 1]} : vector<2x4x8xf32> to vector<2x2x8xf32>
      %80 = tpu.concatenate %78, %79 in 1 : vector<2x2x8xf32>, vector<2x2x8xf32> -> vector<2x4x8xf32>
      %81 = arith.addf %77, %80 : vector<2x4x8xf32>
      %cst_24 = arith.constant 1.000000e-01 : f32
      %82 = vector.broadcast %cst_24 : f32 to vector<2x4x8xf32>
      %83 = arith.mulf %82, %81 : vector<2x4x8xf32>
      %84 = vector.shape_cast %72 : vector<1x8xf32> to vector<1x1x8xf32>
      %85 = vector.broadcast %84 : vector<1x1x8xf32> to vector<2x4x8xf32>
      %86 = arith.addf %85, %83 : vector<2x4x8xf32>
      %cst_25 = arith.constant 0.000000e+00 : f32
      %87 = vector.broadcast %cst_25 : f32 to vector<2x1x8xf32>
      %88 = vector.extract_strided_slice %67 {offsets = [0, 0, 0], sizes = [2, 3, 8], strides = [1, 1, 1]} : vector<2x4x8xf32> to vector<2x3x8xf32>
      %89 = tpu.concatenate %87, %88 in 1 : vector<2x1x8xf32>, vector<2x3x8xf32> -> vector<2x4x8xf32>
      %90 = arith.addf %67, %89 : vector<2x4x8xf32>
      %cst_26 = arith.constant 0.000000e+00 : f32
      %91 = vector.broadcast %cst_26 : f32 to vector<2x2x8xf32>
      %92 = vector.extract_strided_slice %90 {offsets = [0, 0, 0], sizes = [2, 2, 8], strides = [1, 1, 1]} : vector<2x4x8xf32> to vector<2x2x8xf32>
      %93 = tpu.concatenate %91, %92 in 1 : vector<2x2x8xf32>, vector<2x2x8xf32> -> vector<2x4x8xf32>
      %94 = arith.addf %90, %93 : vector<2x4x8xf32>
      %cst_27 = arith.constant 1.000000e-01 : f32
      %95 = vector.broadcast %cst_27 : f32 to vector<2x4x8xf32>
      %96 = arith.mulf %95, %94 : vector<2x4x8xf32>
      %97 = vector.shape_cast %73 : vector<1x8xf32> to vector<1x1x8xf32>
      %98 = vector.broadcast %97 : vector<1x1x8xf32> to vector<2x4x8xf32>
      %99 = arith.addf %98, %96 : vector<2x4x8xf32>
      %cst_28 = arith.constant 1.000000e-01 : f32
      %100 = vector.broadcast %cst_28 : f32 to vector<2x4x8xf32>
      %101 = arith.mulf %100, %65 : vector<2x4x8xf32>
      %102 = arith.subf %86, %101 : vector<2x4x8xf32>
      %cst_29 = arith.constant 1.000000e-01 : f32
      %103 = vector.broadcast %cst_29 : f32 to vector<2x4x8xf32>
      %104 = arith.mulf %103, %67 : vector<2x4x8xf32>
      %105 = arith.subf %99, %104 : vector<2x4x8xf32>
      %106 = math.cos %105 : vector<2x4x8xf32>
      %107 = arith.mulf %106, %102 : vector<2x4x8xf32>
      %cst_30 = arith.constant 0.000000e+00 : f32
      %108 = vector.broadcast %cst_30 : f32 to vector<2x1x8xf32>
      %109 = vector.extract_strided_slice %107 {offsets = [0, 0, 0], sizes = [2, 3, 8], strides = [1, 1, 1]} : vector<2x4x8xf32> to vector<2x3x8xf32>
      %110 = tpu.concatenate %108, %109 in 1 : vector<2x1x8xf32>, vector<2x3x8xf32> -> vector<2x4x8xf32>
      %111 = arith.addf %107, %110 : vector<2x4x8xf32>
      %cst_31 = arith.constant 0.000000e+00 : f32
      %112 = vector.broadcast %cst_31 : f32 to vector<2x2x8xf32>
      %113 = vector.extract_strided_slice %111 {offsets = [0, 0, 0], sizes = [2, 2, 8], strides = [1, 1, 1]} : vector<2x4x8xf32> to vector<2x2x8xf32>
      %114 = tpu.concatenate %112, %113 in 1 : vector<2x2x8xf32>, vector<2x2x8xf32> -> vector<2x4x8xf32>
      %115 = arith.addf %111, %114 : vector<2x4x8xf32>
      %cst_32 = arith.constant 1.000000e-01 : f32
      %116 = vector.broadcast %cst_32 : f32 to vector<2x4x8xf32>
      %117 = arith.mulf %116, %115 : vector<2x4x8xf32>
      %118 = vector.shape_cast %70 : vector<1x8xf32> to vector<1x1x8xf32>
      %119 = vector.broadcast %118 : vector<1x1x8xf32> to vector<2x4x8xf32>
      %120 = arith.addf %119, %117 : vector<2x4x8xf32>
      %121 = math.sin %105 : vector<2x4x8xf32>
      %122 = arith.mulf %121, %102 : vector<2x4x8xf32>
      %cst_33 = arith.constant 0.000000e+00 : f32
      %123 = vector.broadcast %cst_33 : f32 to vector<2x1x8xf32>
      %124 = vector.extract_strided_slice %122 {offsets = [0, 0, 0], sizes = [2, 3, 8], strides = [1, 1, 1]} : vector<2x4x8xf32> to vector<2x3x8xf32>
      %125 = tpu.concatenate %123, %124 in 1 : vector<2x1x8xf32>, vector<2x3x8xf32> -> vector<2x4x8xf32>
      %126 = arith.addf %122, %125 : vector<2x4x8xf32>
      %cst_34 = arith.constant 0.000000e+00 : f32
      %127 = vector.broadcast %cst_34 : f32 to vector<2x2x8xf32>
      %128 = vector.extract_strided_slice %126 {offsets = [0, 0, 0], sizes = [2, 2, 8], strides = [1, 1, 1]} : vector<2x4x8xf32> to vector<2x2x8xf32>
      %129 = tpu.concatenate %127, %128 in 1 : vector<2x2x8xf32>, vector<2x2x8xf32> -> vector<2x4x8xf32>
      %130 = arith.addf %126, %129 : vector<2x4x8xf32>
      %cst_35 = arith.constant 1.000000e-01 : f32
      %131 = vector.broadcast %cst_35 : f32 to vector<2x4x8xf32>
      %132 = arith.mulf %131, %130 : vector<2x4x8xf32>
      %133 = vector.shape_cast %71 : vector<1x8xf32> to vector<1x1x8xf32>
      %134 = vector.broadcast %133 : vector<1x1x8xf32> to vector<2x4x8xf32>
      %135 = arith.addf %134, %132 : vector<2x4x8xf32>
      %c0_36 = arith.constant 0 : index
      %c0_37 = arith.constant 0 : index
      %c0_38 = arith.constant 0 : index
      %c0_39 = arith.constant 0 : index
      %c0_40 = arith.constant 0 : index
      %136 = vector.load %arg5[%c0_36, %c0_37, %c0_38, %c0_39, %c0_40] : memref<1x6x2x4x8xf32, #tpu.memory_space<vmem>>, vector<1x1x2x4x8xf32>
      %137 = vector.shape_cast %136 : vector<1x1x2x4x8xf32> to vector<2x4x8xf32>
      %138 = vector.shape_cast %120 : vector<2x4x8xf32> to vector<1x1x2x4x8xf32>
      tpu.vector_store %arg5[%c0_36, %c0_37, %c0_38, %c0_39, %c0_40], %138 {strides = array<i32>} : memref<1x6x2x4x8xf32, #tpu.memory_space<vmem>>, vector<1x1x2x4x8xf32>,
      %c0_41 = arith.constant 0 : index
      %c1 = arith.constant 1 : index
      %c0_42 = arith.constant 0 : index
      %c0_43 = arith.constant 0 : index
      %c0_44 = arith.constant 0 : index
      %139 = vector.load %arg5[%c0_41, %c1, %c0_42, %c0_43, %c0_44] : memref<1x6x2x4x8xf32, #tpu.memory_space<vmem>>, vector<1x1x2x4x8xf32>
      %140 = vector.shape_cast %139 : vector<1x1x2x4x8xf32> to vector<2x4x8xf32>
      %141 = vector.shape_cast %135 : vector<2x4x8xf32> to vector<1x1x2x4x8xf32>
      tpu.vector_store %arg5[%c0_41, %c1, %c0_42, %c0_43, %c0_44], %141 {strides = array<i32>} : memref<1x6x2x4x8xf32, #tpu.memory_space<vmem>>, vector<1x1x2x4x8xf32>,
      %c0_45 = arith.constant 0 : index
      %c2 = arith.constant 2 : index
      %c0_46 = arith.constant 0 : index
      %c0_47 = arith.constant 0 : index
      %c0_48 = arith.constant 0 : index
      %142 = vector.load %arg5[%c0_45, %c2, %c0_46, %c0_47, %c0_48] : memref<1x6x2x4x8xf32, #tpu.memory_space<vmem>>, vector<1x1x2x4x8xf32>
      %143 = vector.shape_cast %142 : vector<1x1x2x4x8xf32> to vector<2x4x8xf32>
      %144 = vector.shape_cast %86 : vector<2x4x8xf32> to vector<1x1x2x4x8xf32>
      tpu.vector_store %arg5[%c0_45, %c2, %c0_46, %c0_47, %c0_48], %144 {strides = array<i32>} : memref<1x6x2x4x8xf32, #tpu.memory_space<vmem>>, vector<1x1x2x4x8xf32>,
      %c0_49 = arith.constant 0 : index
      %c3 = arith.constant 3 : index
      %c0_50 = arith.constant 0 : index
      %c0_51 = arith.constant 0 : index
      %c0_52 = arith.constant 0 : index
      %145 = vector.load %arg5[%c0_49, %c3, %c0_50, %c0_51, %c0_52] : memref<1x6x2x4x8xf32, #tpu.memory_space<vmem>>, vector<1x1x2x4x8xf32>
      %146 = vector.shape_cast %145 : vector<1x1x2x4x8xf32> to vector<2x4x8xf32>
      %147 = vector.shape_cast %99 : vector<2x4x8xf32> to vector<1x1x2x4x8xf32>
      tpu.vector_store %arg5[%c0_49, %c3, %c0_50, %c0_51, %c0_52], %147 {strides = array<i32>} : memref<1x6x2x4x8xf32, #tpu.memory_space<vmem>>, vector<1x1x2x4x8xf32>,
      %c0_53 = arith.constant 0 : index
      %c4 = arith.constant 4 : index
      %c0_54 = arith.constant 0 : index
      %c0_55 = arith.constant 0 : index
      %c0_56 = arith.constant 0 : index
      %148 = vector.load %arg5[%c0_53, %c4, %c0_54, %c0_55, %c0_56] : memref<1x6x2x4x8xf32, #tpu.memory_space<vmem>>, vector<1x1x2x4x8xf32>
      %149 = vector.shape_cast %148 : vector<1x1x2x4x8xf32> to vector<2x4x8xf32>
      %150 = vector.shape_cast %65 : vector<2x4x8xf32> to vector<1x1x2x4x8xf32>
      tpu.vector_store %arg5[%c0_53, %c4, %c0_54, %c0_55, %c0_56], %150 {strides = array<i32>} : memref<1x6x2x4x8xf32, #tpu.memory_space<vmem>>, vector<1x1x2x4x8xf32>,
      %c0_57 = arith.constant 0 : index
      %c5 = arith.constant 5 : index
      %c0_58 = arith.constant 0 : index
      %c0_59 = arith.constant 0 : index
      %c0_60 = arith.constant 0 : index
      %151 = vector.load %arg5[%c0_57, %c5, %c0_58, %c0_59, %c0_60] : memref<1x6x2x4x8xf32, #tpu.memory_space<vmem>>, vector<1x1x2x4x8xf32>
      %152 = vector.shape_cast %151 : vector<1x1x2x4x8xf32> to vector<2x4x8xf32>
      %153 = vector.shape_cast %67 : vector<2x4x8xf32> to vector<1x1x2x4x8xf32>
      tpu.vector_store %arg5[%c0_57, %c5, %c0_58, %c0_59, %c0_60], %153 {strides = array<i32>} : memref<1x6x2x4x8xf32, #tpu.memory_space<vmem>>, vector<1x1x2x4x8xf32>,
    } else {
    }
    return
  }
  func.func @transform_0(%arg0: i32, %arg1: i32) -> (i32, i32, i32) {
    %c0_i32 = arith.constant 0 : i32
    %c0_i32_0 = arith.constant 0 : i32
    return %arg0, %arg1, %c0_i32 : i32, i32, i32
  }
  func.func @transform_1(%arg0: i32, %arg1: i32) -> (i32, i32, i32) {
    %c0_i32 = arith.constant 0 : i32
    %c0_i32_0 = arith.constant 0 : i32
    %c0_i32_1 = arith.constant 0 : i32
    return %arg0, %c0_i32, %c0_i32_0 : i32, i32, i32
  }
  func.func @transform_2(%arg0: i32, %arg1: i32) -> (i32, i32, i32) {
    %c0_i32 = arith.constant 0 : i32
    %c0_i32_0 = arith.constant 0 : i32
    %c0_i32_1 = arith.constant 0 : i32
    return %arg0, %c0_i32, %c0_i32_0 : i32, i32, i32
  }
  func.func @transform_3(%arg0: i32, %arg1: i32) -> (i32, i32, i32, i32, i32) {
    %c0_i32 = arith.constant 0 : i32
    %c0_i32_0 = arith.constant 0 : i32
    %c0_i32_1 = arith.constant 0 : i32
    %c0_i32_2 = arith.constant 0 : i32
    %c0_i32_3 = arith.constant 0 : i32
    return %arg0, %c0_i32, %c0_i32_0, %c0_i32_1, %c0_i32_2 : i32, i32, i32, i32, i32
  }
}

</mosaic_0001>

<bundles_post_ra>
// kernel: tpu_custom_call.1
= control target key start
LH: loop header
LB: loop body
LE: loop exit
PB: predicated region body
PF: predicated region fallthrough
CT: control target
= control target key end

     0   :  { %8 = vsyncpa [#allocation4], 0  ;;  %s2587_s0 = inlined_call_operand.vmem [shape: bf16[2,256,16], index: 0, kind: input, shape index: {}]   ;;  %s2588_s1 = inlined_call_operand.vmem [shape: f32[2,2,8], index: 1, kind: input, shape index: {}]   ;;  %s2589_s2 = inlined_call_operand.vmem [shape: f32[2,4,8], index: 2, kind: input, shape index: {}]   ;;  %s2590_s3 = inlined_call_operand.hbm [shape: f32[2,6,2,4,8], index: 3, kind: output, shape index: {}]  }
   0x1   :  { %10 = vsyncpa [#allocation4 + $0x1], 0  ;;  %s1937_s12 = smov 0   ;;  %s1939_s13 = smov 0  }
   0x2   :  { %s1941_s14 = smov 0   ;;  %s1943_s15 = smov 0  }
   0x3   :  { %s1945_s16 = smov 0   ;;  %s1947_s17 = smov 0  }
   0x4   :  { %s1949_s18 = smov 0   ;;  %s1951_s19 = smov 0  }
   0x5 LB: > { %s1640_s20 = sadd.s32 4294967295, %s1906_s19   ;;  %s1641_s21 = sadd.s32 4294967294, %s1906_s19   ;;  %s1906_s19 = sphi %s1951_s19, %s16_s19   ;;  %s1902_s18 = sphi %s1949_s18, %s2629_s18   ;;  %s1898_s17 = sphi %s1947_s17, %s2628_s17   ;;  %s1894_s16 = sphi %s1945_s16, %s2627_s16   ;;  %s1890_s15 = sphi %s1943_s15, %s2626_s15   ;;  %s1886_s14 = sphi %s1941_s14, %s2625_s14   ;;  %s1882_s13 = sphi %s1939_s13, %s2624_s13   ;;  %s1878_s12 = sphi %s1937_s12, %s2623_s12  }
   0x6   : > { %s25_s22 = sadd.s32 1, %s1898_s17  ;;  %s28_s23 = sadd.s32 1, %s1902_s18 }
   0x7   : > { %p26_p0 = scmp.ge.s32.totalorder %s25_s22, 2  ;;  %p125_p1 = scmp.ne.s32.totalorder %s1886_s14, %s1882_s13 }
   0x8   : > { %p126_p2 = scmp.eq.s32.totalorder %s1640_s20, 3  ;;  %p131_p4 = scmp.ne.s32.totalorder %s1882_s13, %s1878_s12 }
   0x9   : > { %s2631_s22 = smov (%p26_p0, %s25_s22), 0  ;;  %s2633_s23 = smov (!%p26_p0, %s28_s23), %s1902_s18 }
   0xa   : > { %p1986_p3 = por %p126_p2, %p125_p1  ;;  %p30_p5 = scmp.ge.s32.totalorder %s2633_s23, 2 }
   0xb   : > { %p132_p6 = scmp.eq.s32.totalorder %s1641_s21, 3  ;;  %p1644_p7 = scmp.ge.s32.totalorder %s1906_s19, 1 }
   0xc   : > { %p177_p8 = scmp.lt.s32.totalorder %s1906_s19, 5  ;;  %s2635_s23 = smov (%p30_p5, %s2633_s23), 0 }
   0xd   : > { %p1996_p9 = por %p132_p6, %p131_p4  ;;  %s112_s26 = ssub.s32 %s1902_s18, %s2635_s23 }
   0xe   : > { %p178_p10 = pnand %p1644_p7, %p177_p8  ;;  %s115_s27 = sadd.s32 1, %s1886_s14 }
   0xf   : > { %p113_p11 = scmp.eq.s32.totalorder %s112_s26, 0  ;;  %s210_s29 = sand.u32 (!%p178_p10), 1, %s1882_s13  }
  0x10   : > { %181 = sbr.rel (%p178_p10) target bundleno = 432 (0x1b0), region = 32  ;;  %s1645_s30 = sshll.u32 (!%p178_p10), %s1890_s15, 4 }
  0x11   : > { %s2004_s28 = scalar_select %p113_p11, %s1886_s14, %s115_s27  }
  0x12   : > { %s2010_s4 = smul.u32 (!%p178_p10), 48, %s210_s29  ;;  %p214_p12 = scmp.lt.s32.totalorder (!%p178_p10), %s1894_s16, 1 }
  0x13   : > { %p216_p13 = scmp.lt.s32.totalorder (!%p178_p10), %s1645_s30, 31  ;;  %s1690_s8 = sshll.u32 (!%p178_p10), %s1890_s15, 3 }
  0x14   : > { %p1691_p0 = scmp.ne.s32.totalorder (!%p178_p10), %s1890_s15, 1 }
  0x15   : > { %v238_v0 = vlaneseq  ;;  %s215_s5 = scalar_select %p214_p12, %s1894_s16, 1  ;;  %vm326_vm8 = vcmask 130048   ;;  %vm416_vm9 = vcmask 64512   ;;  %vm497_vm10 = vcmask 1041409  }
  0x16   : > { %s2637_s30 = smov (!%p216_p13, %s1645_s30), 31  ;;  %vm499_vm11 = vcmask 1042434   ;;  %vm501_vm12 = vcmask 1043459   ;;  %vm503_vm13 = vcmask 1044484   ;;  %vm505_vm14 = vcmask 1045509  }
  0x17   : > { %s1648_s6 = sshll.u32 %s215_s5, 1  ;;  %v239_v1 = vshrl.u32 %v238_v0, 7  ;;  %s1649_s10 = sshll.u32 %s215_s5, 2  ;;  %vm507_vm15 = vcmask 1046534  }
  0x18   : > { %s226_s9 = scalar_lea.vmem %s2588_s1, %s1648_s6  ;;  %s2020_s21 = scalar_lea.vmem %s2589_s2, %s1649_s10 }
  0x19   : > { %v232_v2 = vld [vmem:[%s226_s9] sm:$0x3]  ;;  %s1646_s26 = sshll.u32 %s215_s5, 5  ;;  %v240_v6 = vadd.s32 8, %v239_v1  ;;  %s513_s9 = scalar_lea.vmem [#allocation2], %s1690_s8 }
  0x1a   : > { %v233_v3 = vfloor.f32 %v232_v2  ;;  %s219_s27 = sadd.s32 %s1646_s26, %s2637_s30  ;;  %s2100_s10 = scalar_lea.vmem [#allocation3], %s2010_s4 }
  0x1b   : > { %s1647_s5 = sshll.u32 %s219_s27, 2 }
  0x1c   : > { %v234_v4 = vsub.f32 %v232_v2, %v233_v3  ;;  %v1730_v5 = vcvt.f32.s32 %v233_v3  ;;  %s221_s7 = scalar_lea.vmem %s2587_s0, %s1647_s5 }
  0x1d   : > { %v1717_v34 = vld [vmem:[%s221_s7] sm:$0xff]  ;;  %v1719_v35 = vld [vmem:[%s221_s7 + $0x10] sm:$0xff]  ;;  %v1718_v38 = vld [vmem:[%s221_s7 + $0x8] sm:$0xff] }
  0x1e   : > { %v235_v7 = vsub.f32 1.0, %v234_v4  ;;  %v237_v8 = vadd.s32 1, %v1730_v5  ;;  %v241_v9 = vperm.slane %v1730_v5, 0  ;;  %v250_v10 = vperm.slane %v234_v4, 0  ;;  %v1721_v36 = vld [vmem:[%s221_s7 + $0x20] sm:$0xff]  ;;  %v1723_v37 = vld [vmem:[%s221_s7 + $0x30] sm:$0xff] }
  0x1f   : > { %v255_v11 = vperm.slane %v1730_v5, 1  ;;  %v264_v12 = vperm.slane %v234_v4, 1  ;;  %v1720_v39 = vld [vmem:[%s221_s7 + $0x18] sm:$0xff]  ;;  %v1722_v40 = vld [vmem:[%s221_s7 + $0x28] sm:$0xff] }
  0x20   : > { %vm2022_vm0 = vcmp.eq.s32.totalorder %v239_v1, %v241_v9  ;;  %vm2026_vm1 = vcmp.eq.s32.totalorder %v240_v6, %v241_v9  ;;  %v244_v15 = vperm.slane %v235_v7, 0  ;;  %v247_v16 = vperm.slane %v237_v8, 0  ;;  %v1724_v41 = vld [vmem:[%s221_s7 + $0x38] sm:$0xff] }
  0x21   : > { %vm2030_vm2 = vcmp.eq.s32.totalorder %v239_v1, %v255_v11  ;;  %vm2034_vm3 = vcmp.eq.s32.totalorder %v240_v6, %v255_v11  ;;  %v258_v19 = vperm.slane %v235_v7, 1  ;;  %v261_v20 = vperm.slane %v237_v8, 1 }
  0x22   : > { %v245_v21 = vsel %vm2022_vm0, %v244_v15, 0.0  ;;  %v246_v22 = vsel %vm2026_vm1, %v244_v15, 0.0  ;;  %vm248_vm4 = vcmp.eq.s32.totalorder %v239_v1, %v247_v16  ;;  %vm249_vm5 = vcmp.eq.s32.totalorder %v240_v6, %v247_v16 }
  0x23   : > { %v251_v23 = vsel %vm248_vm4, %v250_v10, 0.0  ;;  %v252_v24 = vsel %vm249_vm5, %v250_v10, 0.0  ;;  %v259_v25 = vsel %vm2030_vm2, %v258_v19, 0.0  ;;  %v260_v26 = vsel %vm2034_vm3, %v258_v19, 0.0 }
  0x24   : > { %v253_v27 = vadd.f32 %v251_v23, %v245_v21  ;;  %v254_v28 = vadd.f32 %v252_v24, %v246_v22  ;;  %vm262_vm6 = vcmp.eq.s32.totalorder %v239_v1, %v261_v20  ;;  %vm263_vm7 = vcmp.eq.s32.totalorder %v240_v6, %v261_v20 }
  0x25   : > { %v265_v29 = vsel %vm262_vm6, %v264_v12, 0.0  ;;  %v266_v30 = vsel %vm263_vm7, %v264_v12, 0.0  ;;  %vm509_vm0 = vcmask 1047559  }
  0x26   : > { %v2049_v31 = vadd.f32 %v265_v29, %v259_v25  ;;  %v2051_v32 = vadd.f32 %v266_v30, %v260_v26  ;;  %v285_v33 = vpack.c.bf16 %v254_v28, %v253_v27 }
  0x28   : > { %358 = vmatpush.bf16.msra.mxu0 %v285_v33  ;;  %1725 = vmatpush.bf16.msra.mxu1 %v285_v33 }
  0x29   : > { %1726 = vmatpush.bf16.msra.mxu2 %v285_v33  ;;  %1727 = vmatpush.bf16.msra.mxu3 %v285_v33 }
  0x2b   : > { %1682 = vmatmul.msk.bf16.vlgmr.msra.gmra.mxu0 %vm326_vm8, %v1717_v34  ;;  %1684 = vmatmul.msk.bf16.vlgmr.msra.gmra.mxu1 %vm326_vm8, %v1719_v35 }
  0x2c   : > { %1686 = vmatmul.msk.bf16.vlgmr.msra.gmra.mxu2 %vm326_vm8, %v1721_v36  ;;  %1688 = vmatmul.msk.bf16.vlgmr.msra.gmra.mxu3 %vm326_vm8, %v1723_v37 }
  0x3b   : > { %1683 = vmatmul.msk.bf16.gmra.mxu0 %vm326_vm8, %v1718_v38  ;;  %1685 = vmatmul.msk.bf16.gmra.mxu1 %vm326_vm8, %v1720_v39 }
  0x3c   : > { %1687 = vmatmul.msk.bf16.gmra.mxu2 %vm326_vm8, %v1722_v40  ;;  %1689 = vmatmul.msk.bf16.gmra.mxu3 %vm326_vm8, %v1724_v41 }
  0xa8   : > { %v360_v42 = vpop.f32.mrf.mxu0  ;;  %v370_v43 = vpop.f32.mrf.mxu1 }
  0xa9   : > { %v400_v44 = vmul.f32 %v360_v42, %v2049_v31  ;;  %v404_v45 = vmul.f32 %v370_v43, %v2049_v31 }
  0xab   : > { %v417_v52 = vsel %vm416_vm9, %v400_v44, 0.0  ;;  %v435_v53 = vsel %vm416_vm9, %v404_v45, 0.0 }
  0xaf   : > { %v380_v46 = vpop.f32.mrf.mxu2  ;;  %v390_v47 = vpop.f32.mrf.mxu3 }
  0xb0   : > { %v362_v48 = vpop.f32.mrf.mxu0  ;;  %v372_v49 = vpop.f32.mrf.mxu1  ;;  %v408_v58 = vmul.f32 %v380_v46, %v2049_v31  ;;  %v412_v59 = vmul.f32 %v390_v47, %v2049_v31 }
  0xb1   : > { %v401_v50 = vmul.f32 %v362_v48, %v2051_v32  ;;  %v405_v51 = vmul.f32 %v372_v49, %v2051_v32 }
  0xb2   : > { %v453_v2 = vsel %vm416_vm9, %v408_v58, 0.0  ;;  %v471_v3 = vsel %vm416_vm9, %v412_v59, 0.0 }
  0xb3   : > { %v418_v54 = vsel %vm416_vm9, %v401_v50, 0.0  ;;  %v436_v55 = vsel %vm416_vm9, %v405_v51, 0.0 }
  0xb4   : > { %v419_v56 = vadd.f32 %v418_v54, %v417_v52  ;;  %v437_v57 = vadd.f32 %v436_v55, %v435_v53 }
  0xb6   : > { %v420_v4 = vrot.slane %v419_v56, 4  ;;  %v438_v9 = vrot.slane %v437_v57, 4 }
  0xb7   : > { %v382_v60 = vpop.f32.mrf.mxu2  ;;  %v392_v61 = vpop.f32.mrf.mxu3 }
  0xb8   : > { %v409_v62 = vmul.f32 %v382_v60, %v2051_v32  ;;  %v413_v63 = vmul.f32 %v392_v61, %v2051_v32  ;;  %v365_v0 = vpop.f32.mrf.mxu0  ;;  %v375_v1 = vpop.f32.mrf.mxu1  ;;  %v421_v10 = vadd.f32 %v420_v4, %v419_v56  ;;  %v439_v18 = vadd.f32 %v438_v9, %v437_v57 }
  0xb9   : > { %v402_v11 = vmul.f32 %v365_v0, %v2049_v31  ;;  %v406_v12 = vmul.f32 %v375_v1, %v2049_v31 }
  0xba   : > { %v454_v5 = vsel %vm416_vm9, %v409_v62, 0.0  ;;  %v472_v6 = vsel %vm416_vm9, %v413_v63, 0.0  ;;  %v422_v21 = vrot.slane %v421_v10, 2  ;;  %v440_v30 = vrot.slane %v439_v18, 2 }
  0xbb   : > { %v455_v7 = vadd.f32 %v454_v5, %v453_v2  ;;  %v473_v8 = vadd.f32 %v472_v6, %v471_v3  ;;  %v426_v22 = vsel %vm416_vm9, %v402_v11, 0.0  ;;  %v444_v23 = vsel %vm416_vm9, %v406_v12, 0.0 }
  0xbc   : > { %v423_v37 = vadd.f32 %v422_v21, %v421_v10  ;;  %v441_v46 = vadd.f32 %v440_v30, %v439_v18 }
  0xbd   : > { %v456_v13 = vrot.slane %v455_v7, 4  ;;  %v474_v25 = vrot.slane %v473_v8, 4 }
  0xbe   : > { %v424_v55 = vrot.slane %v423_v37, 1  ;;  %v442_v59 = vrot.slane %v441_v46, 1 }
  0xbf   : > { %v385_v14 = vpop.f32.mrf.mxu2  ;;  %v395_v15 = vpop.f32.mrf.mxu3  ;;  %v457_v24 = vadd.f32 %v456_v13, %v455_v7  ;;  %v475_v39 = vadd.f32 %v474_v25, %v473_v8 }
  0xc0   : > { %v367_v16 = vpop.f32.mrf.mxu0  ;;  %v377_v17 = vpop.f32.mrf.mxu1  ;;  %v410_v33 = vmul.f32 %v385_v14, %v2049_v31  ;;  %v414_v34 = vmul.f32 %v395_v15, %v2049_v31  ;;  %v425_v2 = vadd.f32 %v424_v55, %v423_v37  ;;  %v443_v5 = vadd.f32 %v442_v59, %v441_v46 }
  0xc1   : > { %v403_v19 = vmul.f32 %v367_v16, %v2051_v32  ;;  %v407_v20 = vmul.f32 %v377_v17, %v2051_v32  ;;  %v458_v38 = vrot.slane %v457_v24, 2  ;;  %v476_v56 = vrot.slane %v475_v39, 2 }
  0xc2   : > { %v462_v47 = vsel %vm416_vm9, %v410_v33, 0.0  ;;  %v480_v48 = vsel %vm416_vm9, %v414_v34, 0.0 }
  0xc3   : > { %v427_v26 = vsel %vm416_vm9, %v403_v19, 0.0  ;;  %v445_v27 = vsel %vm416_vm9, %v407_v20, 0.0  ;;  %v459_v52 = vadd.f32 %v458_v38, %v457_v24  ;;  %v477_v3 = vadd.f32 %v476_v56, %v475_v39 }
  0xc4   : > { %v428_v28 = vadd.f32 %v427_v26, %v426_v22  ;;  %v446_v29 = vadd.f32 %v445_v27, %v444_v23 }
  0xc5   : > { %v460_v63 = vrot.slane %v459_v52, 1  ;;  %v478_v14 = vrot.slane %v477_v3, 1 }
  0xc6   : > { %v429_v35 = vrot.slane %v428_v28, 4  ;;  %v447_v36 = vrot.slane %v446_v29, 4 }
  0xc7   : > { %v387_v40 = vpop.f32.mrf.mxu2  ;;  %v397_v41 = vpop.f32.mrf.mxu3  ;;  %v461_v10 = vadd.f32 %v460_v63, %v459_v52  ;;  %v479_v20 = vadd.f32 %v478_v14, %v477_v3 }
  0xc8   : > { %v430_v42 = vadd.f32 %v429_v35, %v428_v28  ;;  %v448_v43 = vadd.f32 %v447_v36, %v446_v29  ;;  %v411_v44 = vmul.f32 %v387_v40, %v2051_v32  ;;  %v415_v45 = vmul.f32 %v397_v41, %v2051_v32 }
  0xca   : > { %v431_v49 = vrot.slane %v430_v42, 2  ;;  %v449_v31 = vrot.slane %v448_v43, 2  ;;  %v463_v50 = vsel %vm416_vm9, %v411_v44, 0.0  ;;  %v481_v51 = vsel %vm416_vm9, %v415_v45, 0.0 }
  0xcb   : > { %v464_v53 = vadd.f32 %v463_v50, %v462_v47  ;;  %v482_v54 = vadd.f32 %v481_v51, %v480_v48 }
  0xcc   : > { %v432_v57 = vadd.f32 %v431_v49, %v430_v42  ;;  %v450_v58 = vadd.f32 %v449_v31, %v448_v43 }
  0xcd   : > { %v465_v32 = vrot.slane %v464_v53, 4  ;;  %v483_v60 = vrot.slane %v482_v54, 4 }
  0xce   : > { %v433_v61 = vrot.slane %v432_v57, 1  ;;  %v451_v62 = vrot.slane %v450_v58, 1 }
  0xcf   : > { %v466_v0 = vadd.f32 %v465_v32, %v464_v53  ;;  %v484_v1 = vadd.f32 %v483_v60, %v482_v54 }
  0xd0   : > { %v434_v4 = vadd.f32 %v433_v61, %v432_v57  ;;  %v452_v9 = vadd.f32 %v451_v62, %v450_v58 }
  0xd1   : > { %v467_v6 = vrot.slane %v466_v0, 2  ;;  %v485_v7 = vrot.slane %v484_v1, 2 }
  0xd2   : > { %v498_v8 = vsel %vm497_vm10, %v434_v4, %v425_v2 }
  0xd3   : > { %v500_v11 = vsel %vm499_vm11, %v443_v5, %v498_v8  ;;  %v468_v12 = vadd.f32 %v467_v6, %v466_v0  ;;  %v486_v13 = vadd.f32 %v485_v7, %v484_v1 }
  0xd4   : > { %v502_v15 = vsel %vm501_vm12, %v452_v9, %v500_v11 }
  0xd5   : > { %v469_v16 = vrot.slane %v468_v12, 1  ;;  %v504_v17 = vsel %vm503_vm13, %v461_v10, %v502_v15  ;;  %v487_v18 = vrot.slane %v486_v13, 1 }
  0xd7   : > { %v470_v19 = vadd.f32 %v469_v16, %v468_v12  ;;  %v488_v22 = vadd.f32 %v487_v18, %v486_v13 }
  0xd8   : > { %518 = sbr.rel (%p1691_p0) target bundleno = 415 (0x19f), region = 36 }
  0xd9   : > { %v506_v21 = vsel %vm505_vm14, %v470_v19, %v504_v17 }
  0xda   : > { %v508_v23 = vsel %vm507_vm15, %v479_v20, %v506_v21 }
  0xdb   : > { %v510_v24 = vsel %vm509_vm0, %v488_v22, %v508_v23 }
  0xdc   : > { %514 = vst.msk [vmem:[%s513_s9] sm:$0xff] %vm416_vm9, %v510_v24 }
  0xdd   : > { %vm548_vm1 = vcmask 1040384   ;;  %v2126_v35 = vld [vmem:[%s2020_s21] sm:$0xf]  ;;  %vm587_vm2 = vcmask 1041408  }
  0xde   : > { %v2598_v46 = vperm.slane %v2126_v35, 2  ;;  %v733_v48 = vperm.slane %v2126_v35, 3 }
  0xe3   : > { %v2103_v25 = vld [vmem:[#allocation2] sm:$0xff]  ;;  %v2105_v26 = vld [vmem:[#allocation2 + $0x8] sm:$0xff] }
  0xe4   : > { %v2108_v27 = vrot.slane %v2103_v25, 2  ;;  %v2111_v28 = vrot.slane %v2103_v25, 4  ;;  %v2114_v29 = vrot.slane %v2105_v26, 2  ;;  %v2117_v30 = vrot.slane %v2103_v25, 6 }
  0xe5   : > { %v2120_v33 = vrot.slane %v2105_v26, 4  ;;  %v2123_v34 = vrot.slane %v2105_v26, 6  ;;  %v2596_v36 = vperm.slane %v2103_v25, 0  ;;  %v649_v39 = vperm.slane %v2103_v25, 1 }
  0xe6   : > { %v2592_v37 = vperm.slane %v2108_v27, 0  ;;  %v2591_v38 = vperm.slane %v2111_v28, 0  ;;  %v650_v40 = vperm.slane %v2108_v27, 1  ;;  %v651_v41 = vperm.slane %v2111_v28, 1 }
  0xe7   : > { %v652_v42 = vperm.slane %v2105_v26, 1  ;;  %v653_v43 = vperm.slane %v2114_v29, 1  ;;  %v654_v44 = vperm.slane %v2120_v33, 1  ;;  %v2153_v51 = vmul.f32 0.1, %v2103_v25 }
  0xe8   : > { %v542_v45 = vsel %vm499_vm11, %v2592_v37, %v2596_v36  ;;  %v655_v47 = vsel %vm499_vm11, %v650_v40, %v649_v39  ;;  %v2162_v55 = vmul.f32 0.1, %v2108_v27  ;;  %v2174_v10 = vmul.f32 0.1, %v2111_v28 }
  0xe9   : > { %v543_v49 = vsel %vm501_vm12, %v2591_v38, %v542_v45  ;;  %v2149_v31 = vsel %vm501_vm12, %v651_v41, %v655_v47  ;;  %v657_v50 = vsel %vm499_vm11, %v653_v43, %v652_v42  ;;  %v2184_v22 = vmul.f32 0.1, %v2117_v30 }
  0xea   : > { %v549_v52 = vsel %vm548_vm1, 0.0, %v543_v49  ;;  %v2157_v53 = vsel %vm501_vm12, %v654_v44, %v657_v50  ;;  %v661_v54 = vsel %vm548_vm1, 0.0, %v2149_v31  ;;  %v776_v43 = vperm.slane %v2153_v51, 0 }
  0xeb   : > { %v553_v56 = vrot.slane %v549_v52, 2  ;;  %v555_v57 = vrot.slane %v549_v52, 1  ;;  %v567_v58 = vadd.f32 %v549_v52, %v2103_v25  ;;  %v662_v59 = vsel %vm548_vm1, 0.0, %v2157_v53 }
  0xec   : > { %v665_v32 = vrot.slane %v661_v54, 2  ;;  %v666_v60 = vrot.slane %v662_v59, 2  ;;  %v667_v61 = vrot.slane %v661_v54, 7  ;;  %v669_v62 = vrot.slane %v662_v59, 7 }
  0xed   : > { %v556_v63 = vrot.slane %v553_v56, 1  ;;  %v568_v0 = vadd.f32 %v555_v57, %v2108_v27  ;;  %v569_v1 = vadd.f32 %v553_v56, %v2111_v28  ;;  %v579_v2 = vperm.slane %v567_v58, 0 }
  0xee   : > { %v668_v3 = vrot.slane %v665_v32, 7  ;;  %v670_v4 = vrot.slane %v666_v60, 7  ;;  %v679_v5 = vadd.f32 %v667_v61, %v2103_v25  ;;  %v680_v6 = vadd.f32 %v661_v54, %v2108_v27 }
  0xef   : > { %v570_v7 = vadd.f32 %v556_v63, %v2117_v30  ;;  %v580_v8 = vperm.slane %v568_v0, 0  ;;  %v683_v9 = vadd.f32 %v669_v62, %v2105_v26  ;;  %v682_v12 = vadd.f32 %v665_v32, %v2117_v30 }
  0xf0   : > { %v681_v11 = vadd.f32 %v668_v3, %v2111_v28  ;;  %v684_v13 = vadd.f32 %v662_v59, %v2114_v29  ;;  %v685_v14 = vadd.f32 %v670_v4, %v2120_v33  ;;  %v691_v16 = vperm.slane %v679_v5, 1 }
  0xf1   : > { %v583_v15 = vsel %vm501_vm12, %v580_v8, %v579_v2  ;;  %v692_v17 = vperm.slane %v680_v6, 1  ;;  %v693_v18 = vperm.slane %v683_v9, 1  ;;  %v686_v20 = vadd.f32 %v666_v60, %v2123_v34 }
  0xf2   : > { %v588_v19 = vsel %vm587_vm2, 0.0, %v583_v15  ;;  %v694_v21 = vperm.slane %v684_v13, 1  ;;  %v777_v44 = vperm.slane %v2162_v55, 0 }
  0xf3   : > { %v592_v23 = vrot.slane %v588_v19, 2  ;;  %v594_v24 = vrot.slane %v588_v19, 1  ;;  %v606_v39 = vadd.f32 %v588_v19, %v567_v58  ;;  %v695_v40 = vsel %vm501_vm12, %v692_v17, %v691_v16 }
  0xf4   : > { %v696_v41 = vsel %vm501_vm12, %v694_v21, %v693_v18  ;;  %v699_v42 = vsel %vm587_vm2, 0.0, %v695_v40 }
  0xf5   : > { %v595_v45 = vrot.slane %v592_v23, 1  ;;  %v607_v47 = vadd.f32 %v594_v24, %v568_v0  ;;  %v608_v49 = vadd.f32 %v592_v23, %v569_v1  ;;  %v614_v50 = vmul.f32 0.1, %v606_v39 }
  0xf6   : > { %v700_v52 = vsel %vm587_vm2, 0.0, %v696_v41  ;;  %v703_v54 = vrot.slane %v699_v42, 2  ;;  %v705_v56 = vrot.slane %v699_v42, 7  ;;  %v718_v57 = vadd.f32 %v699_v42, %v680_v6 }
  0xf7   : > { %v609_v58 = vadd.f32 %v595_v45, %v570_v7  ;;  %v615_v59 = vmul.f32 0.1, %v607_v47  ;;  %v616_v32 = vmul.f32 0.1, %v608_v49  ;;  %v631_v60 = vperm.slane %v614_v50, 0 }
  0xf8   : > { %v704_v61 = vrot.slane %v700_v52, 2  ;;  %v706_v62 = vrot.slane %v703_v54, 7  ;;  %v707_v63 = vrot.slane %v700_v52, 7  ;;  %v717_v2 = vadd.f32 %v705_v56, %v679_v5 }
  0xf9   : > { %v617_v3 = vmul.f32 0.1, %v609_v58  ;;  %v632_v4 = vperm.slane %v615_v59, 0  ;;  %v633_v8 = vperm.slane %v616_v32, 0  ;;  %v720_v15 = vadd.f32 %v703_v54, %v682_v12 }
  0xfa   : > { %v708_v0 = vrot.slane %v704_v61, 7  ;;  %v719_v1 = vadd.f32 %v706_v62, %v681_v11  ;;  %v721_v16 = vadd.f32 %v707_v63, %v683_v9  ;;  %v722_v17 = vadd.f32 %v700_v52, %v684_v13 }
  0xfb   : > { %v634_v18 = vperm.slane %v617_v3, 0  ;;  %v639_v19 = vsel %vm497_vm10, %v632_v4, %v631_v60  ;;  %v724_v6 = vadd.f32 %v704_v61, %v686_v20  ;;  %v725_v7 = vmul.f32 0.1, %v717_v2 }
  0xfc   : > { %v640_v21 = vsel %vm499_vm11, %v633_v8, %v639_v19  ;;  %v723_v23 = vadd.f32 %v708_v0, %v685_v14  ;;  %v726_v24 = vmul.f32 0.1, %v718_v57  ;;  %v727_v39 = vmul.f32 0.1, %v719_v1 }
  0xfd   : > { %v641_v5 = vsel %vm501_vm12, %v634_v18, %v640_v21  ;;  %v728_v40 = vmul.f32 0.1, %v720_v15  ;;  %v729_v41 = vmul.f32 0.1, %v721_v16  ;;  %v730_v42 = vmul.f32 0.1, %v722_v17 }
  0xfe   : > { %v2197_v11 = vadd.f32 %v641_v5, %v2598_v46  ;;  %v731_v9 = vmul.f32 0.1, %v723_v23  ;;  %v742_v12 = vperm.slane %v725_v7, 1  ;;  %v778_v13 = vperm.slane %v2174_v10, 0 }
  0xff   : > { %v743_v20 = vperm.slane %v726_v24, 1  ;;  %v744_v45 = vperm.slane %v727_v39, 1  ;;  %v745_v47 = vperm.slane %v728_v40, 1  ;;  %v746_v49 = vperm.slane %v729_v41, 1 }
 0x100   : > { %v732_v14 = vmul.f32 0.1, %v724_v6  ;;  %v747_v50 = vperm.slane %v730_v42, 1  ;;  %v748_v52 = vperm.slane %v731_v9, 1  ;;  %v779_v54 = vperm.slane %v2184_v22, 0 }
 0x101   : > { %v750_v56 = vsel %vm497_vm10, %v743_v20, %v742_v12  ;;  %v784_v57 = vsel %vm497_vm10, %v777_v44, %v776_v43  ;;  %v794_v58 = vperm.slane %v2153_v51, 1  ;;  %v795_v59 = vperm.slane %v2162_v55, 1 }
 0x102   : > { %v751_v32 = vsel %vm499_vm11, %v744_v45, %v750_v56  ;;  %v753_v60 = vsel %vm497_vm10, %v747_v50, %v746_v49  ;;  %v785_v61 = vsel %vm499_vm11, %v778_v13, %v784_v57  ;;  %v796_v62 = vperm.slane %v2174_v10, 1 }
 0x103   : > { %v752_v63 = vsel %vm501_vm12, %v745_v47, %v751_v32  ;;  %v786_v2 = vsel %vm501_vm12, %v779_v54, %v785_v61  ;;  %v797_v3 = vperm.slane %v2184_v22, 1  ;;  %v749_v4 = vperm.slane %v732_v14, 1 }
 0x104   : > { %v2214_v51 = vadd.f32 %v752_v63, %v733_v48  ;;  %v2217_v55 = vsub.f32 %v2197_v11, %v786_v2  ;;  %v802_v43 = vsel %vm497_vm10, %v795_v59, %v794_v58  ;;  %v754_v44 = vsel %vm499_vm11, %v748_v52, %v753_v60 }
 0x105   : > { %v803_v10 = vsel %vm499_vm11, %v796_v62, %v802_v43  ;;  %v2227_v22 = vmul.f32 0.1, %v2105_v26  ;;  %v755_v0 = vsel %vm501_vm12, %v749_v4, %v754_v44  ;;  %v2231_v1 = vmul.f32 0.1, %v2114_v29 }
 0x106   : > { %v804_v8 = vsel %vm501_vm12, %v797_v3, %v803_v10  ;;  %v2234_v16 = vmul.f32 0.1, %v2120_v33  ;;  %v2237_v17 = vmul.f32 0.1, %v2123_v34  ;;  %v2246_v23 = vadd.f32 %v755_v0, %v733_v48 }
 0x107   : > { %v2224_v15 = vsub.f32 %v2214_v51, %v804_v8  ;;  %v798_v19 = vperm.slane %v2227_v22, 1  ;;  %v799_v6 = vperm.slane %v2231_v1, 1  ;;  %v2600_v52 = vmov 683565275  }
 0x108   : > { %v800_v7 = vperm.slane %v2234_v16, 1  ;;  %v801_v21 = vperm.slane %v2237_v17, 1  ;;  %v1909_v56 = vmov 2475754826   ;;  %v1910_v58 = vmov 2131351028  }
 0x109   : > { %v815_v18 = vand.u32 2139095040, %v2224_v15  ;;  %v2599_v24 = vand.u32 2147483647, %v2224_v15  ;;  %v805_v5 = vsel %vm497_vm10, %v799_v6, %v798_v19  ;;  %v1911_v32 = vmov 2102212464  }
 0x10a   : > { %v806_v41 = vsel %vm499_vm11, %v800_v7, %v805_v5  ;;  %v1912_v61 = vmov 920167782   ;;  %v1913_v44 = vmov 1326507024  }
 0x10b   : > { %v816_v39 = vshrl.u32 %v815_v18, 23  ;;  %v807_v42 = vsel %vm501_vm12, %v801_v21, %v806_v41  ;;  %v819_v9 = vand.u32 8388607, %v2599_v24 }
 0x10c   : > { %v2255_v13 = vsub.f32 %v2246_v23, %v807_v42 }
 0x10d   : > { %v1692_v40 = vadd.s32 4294967169, %v816_v39  ;;  %v820_v45 = vor.u32 8388608, %v819_v9 }
 0x10e   : > { %v969_v20 = vand.u32 2139095040, %v2255_v13 }
 0x10f   : > { %v822_v12 = vadd.s32 1, %v1692_v40  ;;  %v2268_v4 = vshll.u32 %v820_v45, 8 }
 0x110   : > { %v970_v14 = vshrl.u32 %v969_v20, 23 }
 0x111   : > { %vm823_vm3 = vcmp.gt.s32.totalorder %v822_v12, 0 }
 0x112   : > { %v824_v48 = vsel %vm823_vm3, %v822_v12, 0  ;;  %v1695_v19 = vadd.s32 4294967169, %v970_v14  ;;  %v861_v12 = vand.u32 65535, %v2268_v4 }
 0x113   : > { %v826_v47 = vand.u32 31, %v824_v48  ;;  %v2258_v49 = vshrl.u32 %v824_v48, 5  ;;  %v862_v48 = vshrl.u32 %v2268_v4, 16 }
 0x114   : > { %v976_v41 = vadd.s32 1, %v1695_v19 }
 0x115   : > { %v827_v50 = vsub.s32 32, %v826_v47  ;;  %v829_v54 = vshll.u32 %v2600_v52, %v826_v47  ;;  %v832_v57 = vshll.u32 %v1909_v56, %v826_v47  ;;  %v835_v59 = vshll.u32 %v1910_v58, %v826_v47 }
 0x116   : > { %v838_v60 = vshll.u32 %v1911_v32, %v826_v47  ;;  %v841_v62 = vshll.u32 %v1912_v61, %v826_v47  ;;  %vm844_vm4 = vcmp.lt.s32.totalorder %v2258_v49, 1  ;;  %vm847_vm5 = vcmp.lt.s32.totalorder %v2258_v49, 4 }
 0x117   : > { %v830_v63 = vshrl.u32 %v1909_v56, %v827_v50  ;;  %v833_v2 = vshrl.u32 %v1910_v58, %v827_v50  ;;  %v836_v3 = vshrl.u32 %v1911_v32, %v827_v50  ;;  %v839_v43 = vshrl.u32 %v1912_v61, %v827_v50 }
 0x118   : > { %v842_v10 = vshrl.u32 %v1913_v44, %v827_v50  ;;  %vm846_vm6 = vcmp.lt.s32.totalorder %v2258_v49, 3  ;;  %vm845_vm7 = vcmp.lt.s32.totalorder %v2258_v49, 2  ;;  %v2597_v47 = vand.u32 2147483647, %v2255_v13 }
 0x119   : > { %v831_v8 = vor.u32 %v830_v63, %v829_v54  ;;  %v834_v0 = vor.u32 %v833_v2, %v832_v57  ;;  %v837_v18 = vor.u32 %v836_v3, %v835_v59  ;;  %v840_v6 = vor.u32 %v839_v43, %v838_v60 }
 0x11a   : > { %v843_v7 = vor.u32 %v842_v10, %v841_v62  ;;  %vm977_vm8 = vcmp.gt.s32.totalorder %v976_v41, 0  ;;  %v828_v60 = vshrl.u32 %v2600_v52, %v827_v50 }
 0x11b   : > { %v852_v21 = vsel %vm844_vm4, %v831_v8, %v834_v0  ;;  %v856_v39 = vsel %vm844_vm4, %v834_v0, %v837_v18  ;;  %v853_v5 = vsel %vm847_vm5, %v840_v6, 920167782  ;;  %v849_v62 = vsel %vm847_vm5, %v837_v18, 2102212464 }
 0x11c   : > { %v857_v40 = vsel %vm847_vm5, %v843_v7, 1326507024  ;;  %v854_v42 = vsel %vm846_vm6, %v837_v18, %v853_v5  ;;  %v973_v5 = vand.u32 8388607, %v2597_v47  ;;  %v850_v18 = vsel %vm846_vm6, %v834_v0, %v849_v62 }
 0x11d   : > { %v858_v9 = vsel %vm846_vm6, %v840_v6, %v857_v40  ;;  %v855_v20 = vsel %vm845_vm7, %v852_v21, %v854_v42  ;;  %v978_v6 = vsel %vm977_vm8, %v976_v41, 0  ;;  %v848_v40 = vsel %vm844_vm4, %v828_v60, %v831_v8 }
 0x11e   : > { %v859_v45 = vsel %vm845_vm7, %v856_v39, %v858_v9  ;;  %v885_v57 = vand.u32 65535, %v855_v20  ;;  %v886_v59 = vshrl.u32 %v855_v20, 16  ;;  %v1914_v41 = vmov 0  }
 0x11f   : > { %v863_v14 = vand.u32 65535, %v859_v45  ;;  %v864_v54 = vshrl.u32 %v859_v45, 16  ;;  %v974_v37 = vor.u32 8388608, %v973_v5  ;;  %v2322_v5 = vshrl.u32 %v978_v6, 5 }
 0x120   : > { %v887_v43 = vmul.u32 %v885_v57, %v861_v12  ;;  %v888_v10 = vmul.u32 %v886_v59, %v861_v12  ;;  %v889_v19 = vmul.u32 %v885_v57, %v862_v48  ;;  %v890_v50 = vmul.u32 %v886_v59, %v862_v48 }
 0x121   : > { %v865_v63 = vmul.u32 %v863_v14, %v861_v12  ;;  %v866_v2 = vmul.u32 %v864_v54, %v861_v12  ;;  %v867_v3 = vmul.u32 %v863_v14, %v862_v48  ;;  %v868_v7 = vmul.u32 %v864_v54, %v862_v48 }
 0x122   : > { %v891_v42 = vshll.u32 %v888_v10, 16  ;;  %v893_v9 = vshll.u32 %v889_v19, 16  ;;  %v980_v12 = vand.u32 31, %v978_v6  ;;  %v892_v38 = vshrl.u32 %v888_v10, 16 }
 0x123   : > { %v869_v21 = vshll.u32 %v866_v2, 16  ;;  %v871_v39 = vshll.u32 %v867_v3, 16  ;;  %v870_v45 = vshrl.u32 %v866_v2, 16  ;;  %v872_v0 = vshrl.u32 %v867_v3, 16 }
 0x124   : > { %vm895_vm14 = vc.u32 %v887_v43, %v891_v42  ;;  %v897_v54 = vadd.s32 %v891_v42, %v887_v43  ;;  %v2307_v60 = vsub.s32 32, %v980_v12  ;;  %v894_v2 = vshrl.u32 %v889_v19, 16 }
 0x125   : > { %vm873_vm9 = vc.u32 %v865_v63, %v869_v21  ;;  %v875_v20 = vadd.s32 %v869_v21, %v865_v63  ;;  %v896_v8 = vsel %vm895_vm14, 1, %v1914_v41  ;;  %v851_v43 = vsel %vm845_vm7, %v848_v40, %v850_v18 }
 0x126   : > { %v874_v14 = vsel %vm873_vm9, 1, %v1914_v41  ;;  %v898_v59 = vadd.s32 %v896_v8, %v890_v50  ;;  %vm899_vm0 = vc.u32 %v897_v54, %v893_v9  ;;  %v2312_v10 = vadd.s32 %v897_v54, %v893_v9 }
 0x127   : > { %v876_v57 = vadd.s32 %v874_v14, %v868_v7  ;;  %vm877_vm15 = vc.u32 %v875_v20, %v871_v39  ;;  %v900_v63 = vsel %vm899_vm0, 1, %v1914_v41  ;;  %v986_v39 = vshll.u32 %v1909_v56, %v980_v12 }
 0x128   : > { %v878_v48 = vsel %vm877_vm15, 1, %v1914_v41  ;;  %v902_v21 = vadd.s32 %v900_v63, %v898_v59  ;;  %v987_v50 = vshrl.u32 %v1910_v58, %v2307_v60  ;;  %v989_v3 = vshll.u32 %v1910_v58, %v980_v12 }
 0x129   : > { %v880_v62 = vadd.s32 %v878_v48, %v876_v57  ;;  %v990_v20 = vshrl.u32 %v1911_v32, %v2307_v60  ;;  %v995_v49 = vshll.u32 %v1912_v61, %v980_v12  ;;  %v996_v40 = vshrl.u32 %v1913_v44, %v2307_v60 }
 0x12a   : > { %v903_v42 = vadd.s32 %v902_v21, %v892_v38  ;;  %v905_v38 = vmul.u32 %v2268_v4, %v851_v43  ;;  %v992_v18 = vshll.u32 %v1911_v32, %v980_v12  ;;  %v2595_v58 = vperm.slane %v2105_v26, 0 }
 0x12b   : > { %v881_v7 = vadd.s32 %v880_v62, %v870_v45  ;;  %v2329_v45 = vshll.u32 %v974_v37, 8  ;;  %v2594_v6 = vperm.slane %v2114_v29, 0  ;;  %v993_v14 = vshrl.u32 %v1912_v61, %v2307_v60 }
 0x12c   : > { %v904_v9 = vadd.s32 %v903_v42, %v894_v2  ;;  %v2593_v44 = vperm.slane %v2120_v33, 0  ;;  %v2338_v57 = vor.u32 %v987_v50, %v986_v39  ;;  %v2340_v4 = vor.u32 %v990_v20, %v989_v3 }
 0x12d   : > { %v2320_v19 = vadd.s32 %v881_v7, %v872_v0  ;;  %v544_v37 = vsel %vm499_vm11, %v2594_v6, %v2595_v58  ;;  %v983_v32 = vshll.u32 %v2600_v52, %v980_v12  ;;  %v997_v8 = vor.u32 %v996_v40, %v995_v49 }
 0x12e   : > { %v908_v54 = vadd.s32 1, %v904_v9  ;;  %vm998_vm4 = vcmp.lt.s32.totalorder %v2322_v5, 1  ;;  %v545_v61 = vsel %vm501_vm12, %v2593_v44, %v544_v37  ;;  %v984_v59 = vshrl.u32 %v1909_v56, %v2307_v60 }
 0x12f   : > { %vm907_vm3 = vc.u32 %v2320_v19, %v2312_v10  ;;  %vm1001_vm5 = vcmp.lt.s32.totalorder %v2322_v5, 4  ;;  %v550_v62 = vsel %vm548_vm1, 0.0, %v545_v61  ;;  %v994_v63 = vor.u32 %v993_v14, %v992_v18 }
 0x130   : > { %v909_v48 = vsel %vm907_vm3, %v908_v54, %v904_v9  ;;  %vm1000_vm6 = vcmp.lt.s32.totalorder %v2322_v5, 3  ;;  %v557_v12 = vrot.slane %v550_v62, 1  ;;  %vm999_vm7 = vcmp.lt.s32.totalorder %v2322_v5, 2 }
 0x131   : > { %v910_v0 = vadd.s32 %v909_v48, %v905_v38  ;;  %v1010_v2 = vsel %vm998_vm4, %v2338_v57, %v2340_v4  ;;  %v1011_v56 = vsel %vm1001_vm5, %v997_v8, 1326507024  ;;  %v571_v43 = vadd.f32 %v550_v62, %v2105_v26 }
 0x132   : > { %v572_v7 = vadd.f32 %v557_v12, %v2114_v29  ;;  %v2366_v39 = vor.u32 %v984_v59, %v983_v32  ;;  %v1012_v42 = vsel %vm1000_vm6, %v994_v63, %v1011_v56  ;;  %v1007_v3 = vsel %vm1001_vm5, %v994_v63, 920167782 }
 0x133   : > { %v911_v21 = vadd.s32 536870912, %v910_v0  ;;  %v1013_v20 = vsel %vm999_vm7, %v1010_v2, %v1012_v42  ;;  %v1015_v49 = vand.u32 65535, %v2329_v45  ;;  %v581_v40 = vperm.slane %v571_v43, 0 }
 0x134   : > { %v582_v9 = vperm.slane %v572_v7, 0  ;;  %v1018_v38 = vshrl.u32 %v1013_v20, 16  ;;  %v1016_v14 = vshrl.u32 %v2329_v45, 16  ;;  %v1017_v54 = vand.u32 65535, %v1013_v20 }
 0x135   : > { %v2370_v50 = vshrl.u32 %v911_v21, 30  ;;  %v1006_v37 = vsel %vm998_vm4, %v2366_v39, %v2338_v57  ;;  %v1008_v32 = vsel %vm1000_vm6, %v2340_v4, %v1007_v3  ;;  %v554_v2 = vrot.slane %v550_v62, 2 }
 0x136   : > { %v584_v48 = vsel %vm501_vm12, %v582_v9, %v581_v40  ;;  %v2387_v61 = vmul.u32 %v1018_v38, %v1015_v49  ;;  %v1009_v63 = vsel %vm999_vm7, %v1006_v37, %v1008_v32  ;;  %v2391_v12 = vmul.u32 %v1017_v54, %v1016_v14 }
 0x137   : > { %v913_v18 = vshll.u32 %v2370_v50, 30  ;;  %v589_v21 = vsel %vm587_vm2, 0.0, %v584_v48  ;;  %v1019_v42 = vmul.u32 %v1017_v54, %v1015_v49  ;;  %v906_v9 = vadd.s32 %v2312_v10, %v2320_v19 }
 0x138   : > { %v1023_v20 = vshll.u32 %v2387_v61, 16  ;;  %v1025_v40 = vshll.u32 %v2391_v12, 16  ;;  %v558_v6 = vrot.slane %v554_v2, 1  ;;  %v1039_v37 = vand.u32 65535, %v1009_v63 }
 0x139   : > { %v914_v8 = vsub.s32 %v910_v0, %v913_v18  ;;  %v1040_v0 = vshrl.u32 %v1009_v63, 16  ;;  %v596_v18 = vrot.slane %v589_v21, 1  ;;  %v593_v32 = vrot.slane %v589_v21, 2 }
 0x13a   : > { %v1022_v58 = vmul.u32 %v1018_v38, %v1016_v14  ;;  %vm1027_vm9 = vc.u32 %v1019_v42, %v1023_v20  ;;  %v1029_v62 = vadd.s32 %v1023_v20, %v1019_v42  ;;  %v573_v54 = vadd.f32 %v554_v2, %v2120_v33 }
 0x13b   : > { %vm915_vm8 = vcmp.lt.s32.totalorder %v914_v8, 0  ;;  %v916_v59 = vsub.s32 0, %v914_v8  ;;  %v610_v48 = vadd.f32 %v589_v21, %v571_v43  ;;  %v611_v36 = vadd.f32 %v596_v18, %v572_v7 }
 0x13c   : > { %v1028_v47 = vsel %vm1027_vm9, 1, %v1914_v41  ;;  %vm1031_vm15 = vc.u32 %v1029_v62, %v1025_v40  ;;  %v574_v19 = vadd.f32 %v558_v6, %v2123_v34  ;;  %v597_v63 = vrot.slane %v593_v32, 1 }
 0x13d   : > { %v917_v56 = vsel %vm915_vm8, %v916_v59, %v914_v8  ;;  %v1042_v59 = vmul.u32 %v1040_v0, %v1015_v49  ;;  %v1043_v38 = vmul.u32 %v1039_v37, %v1016_v14  ;;  %v612_v20 = vadd.f32 %v593_v32, %v573_v54 }
 0x13e   : > { %v918_v3 = vclz %v917_v56  ;;  %v1032_v2 = vsel %vm1031_vm15, 1, %v1914_v41  ;;  %vm814_vm0 = vcmp.lt.s32.totalorder %v2224_v15, 0  ;;  %v619_v43 = vmul.f32 0.1, %v611_v36 }
 0x13f   : > { %v1041_v7 = vmul.u32 %v1039_v37, %v1015_v49  ;;  %v1045_v21 = vshll.u32 %v1042_v59, 16  ;;  %v2611_v6 = vmov 683565275   ;;  %v620_v36 = vmul.f32 0.1, %v612_v20 }
 0x140   : > { %v1693_v44 = vadd.s32 4294967294, %v918_v3  ;;  %v1030_v3 = vadd.s32 %v1028_v47, %v1022_v58  ;;  %v982_v47 = vshrl.u32 %v2611_v6, %v2307_v60  ;;  %v1044_v58 = vmul.u32 %v1040_v0, %v1016_v14 }
 0x141   : > { %vm1049_vm3 = vc.u32 %v1041_v7, %v1045_v21  ;;  %v636_v37 = vperm.slane %v619_v43, 0  ;;  %v1046_v14 = vshrl.u32 %v1042_v59, 16  ;;  %v637_v20 = vperm.slane %v620_v36, 0 }
 0x142   : > { %vm1694_vm14 = vcmp.lt.s32.totalorder %v1693_v44, 0  ;;  %v1034_v62 = vadd.s32 %v1032_v2, %v1030_v3  ;;  %v1050_v60 = vsel %vm1049_vm3, 1, %v1914_v41  ;;  %v2612_v3 = vand.u32 2147483647, %v2224_v15 }
 0x143   : > { %v921_v56 = vsel %vm1694_vm14, 0, %v1693_v44  ;;  %v618_v44 = vmul.f32 0.1, %v610_v48  ;;  %v613_v48 = vadd.f32 %v597_v63, %v574_v19  ;;  %v1052_v0 = vadd.s32 %v1050_v60, %v1044_v58 }
 0x144   : > { %v922_v46 = vsub.s32 32, %v921_v56  ;;  %v923_v24 = vshll.u32 %v914_v8, %v921_v56  ;;  %v926_v10 = vsub.s32 4294967266, %v921_v56  ;;  %v1024_v8 = vshrl.u32 %v2387_v61, 16 }
 0x145   : > { %v635_v49 = vperm.slane %v618_v44, 0  ;;  %v621_v19 = vmul.f32 0.1, %v613_v48  ;;  %vm2420_vm8 = vcmp.le.f32.partialorder %v2612_v3, 0.7853982  ;;  %v1048_v2 = vshrl.u32 %v1043_v38, 16 }
 0x146   : > { %v924_v52 = vshrl.u32 %v906_v9, %v922_v46  ;;  %v927_v42 = vadd.s32 127, %v926_v10  ;;  %v1003_v46 = vsel %vm1001_vm5, %v2340_v4, 2102212464  ;;  %v1047_v9 = vshll.u32 %v1043_v38, 16 }
 0x147   : > { %v1035_v56 = vadd.s32 %v1034_v62, %v1024_v8  ;;  %v1002_v4 = vsel %vm998_vm4, %v982_v47, %v2366_v39  ;;  %v642_v44 = vsel %vm497_vm10, %v636_v37, %v635_v49  ;;  %v936_v5 = vsub.s32 4, %v2370_v50 }
 0x148   : > { %v925_v18 = vor.u32 %v924_v52, %v923_v24  ;;  %v928_v40 = vshll.u32 %v927_v42, 23  ;;  %v1026_v24 = vshrl.u32 %v2391_v12, 16  ;;  %v1051_v52 = vadd.s32 %v1045_v21, %v1041_v7 }
 0x149   : > { %v1004_v12 = vsel %vm1000_vm6, %v2338_v57, %v1003_v46  ;;  %v643_v38 = vsel %vm499_vm11, %v637_v20, %v642_v44  ;;  %vm1484_vm6 = vcmask 60416   ;;  %v2615_v49 = vperm.slane %v2126_v35, 2 }
 0x14a   : > { %v929_v32 = vor.u32 4788187, %v928_v40  ;;  %v932_v54 = vcvt.s32.f32 %v925_v18  ;;  %vm1053_vm5 = vc.u32 %v1051_v52, %v1047_v9  ;;  %v1036_v43 = vadd.s32 %v1035_v56, %v1026_v24  ;;  %1706 = vst.msk [vmem:[%s2100_s10 + $0x10] sm:$0xf] %vm1484_vm6, %v2197_v11 }
 0x14b   : > { %v1054_v63 = vsel %vm1053_vm5, 1, %v1914_v41  ;;  %v1055_v7 = vadd.s32 %v1051_v52, %v1047_v9  ;;  %v1005_v21 = vsel %vm999_vm7, %v1002_v4, %v1004_v12  ;;  %v638_v18 = vperm.slane %v621_v19, 0  ;;  %1708 = vst.msk [vmem:[%s2100_s10 + $0x18] sm:$0xf] %vm1484_vm6, %v2214_v51 }
 0x14c   : > { %v930_v61 = vand.u32 2147483647, %v929_v32  ;;  %v1056_v39 = vadd.s32 %v1054_v63, %v1052_v0  ;;  %v1059_v6 = vmul.u32 %v2329_v45, %v1005_v21  ;;  %v937_v45 = vsel %vm814_vm0, %v936_v5, %v2370_v50  ;;  %1709 = vst.msk [vmem:[%s2100_s10 + $0x1c] sm:$0xf] %vm1484_vm6, %v2246_v23 }
 0x14d   : > { %vm1061_vm4 = vc.u32 %v1036_v43, %v1055_v7  ;;  %v644_v9 = vsel %vm501_vm12, %v638_v18, %v643_v38  ;;  %v939_v11 = vsel %vm2420_vm8, 0, %v937_v45 }
 0x14e   : > { %v933_v10 = vmul.f32 %v932_v54, %v930_v61  ;;  %v1057_v57 = vadd.s32 %v1056_v39, %v1046_v14  ;;  %v2447_v24 = vadd.f32 %v644_v9, %v2615_v49  ;;  %v956_v51 = vand.u32 3, %v939_v11 }
 0x150   : > { %v934_v59 = vxor.u32 2147483648, %v933_v10  ;;  %v1058_v8 = vadd.s32 %v1057_v57, %v1048_v2  ;;  %1707 = vst.msk [vmem:[%s2100_s10 + $0x14] sm:$0xf] %vm1484_vm6, %v2447_v24  ;;  %vm961_vm7 = vcmp.eq.s32.totalorder %v956_v51, 2  ;;  %vm958_vm14 = vcmp.eq.s32.totalorder %v956_v51, 0 }
 0x151   : > { %vm957_vm15 = vcmp.lt.s32.totalorder %v956_v51, 2 }
 0x152   : > { %v935_v41 = vsel %vm814_vm0, %v934_v59, %v933_v10  ;;  %v1062_v47 = vadd.s32 1, %v1058_v8  ;;  %vm955_vm0 = vweird.f32 %v2224_v15 }
 0x153   : > { %v938_v40 = vsel %vm2420_vm8, %v2224_v15, %v935_v41  ;;  %v1291_v41 = vadd.s32 3, %v939_v11 }
 0x154   : > { %v940_v62 = vmul.f32 %v938_v40, %v938_v40  ;;  %v1063_v32 = vsel %vm1061_vm4, %v1062_v47, %v1058_v8 }
 0x155   : > { %v1064_v36 = vadd.s32 %v1063_v32, %v1059_v6  ;;  %v1292_v8 = vand.u32 3, %v1291_v41  ;;  %v781_v41 = vperm.slane %v2231_v1, 0  ;;  %v2619_v1 = vperm.slane %v2111_v28, 0 }
 0x156   : > { %v941_v46 = vmul.f32 -0.001358992, %v940_v62  ;;  %v948_v58 = vmul.f32 -0.00019511016, %v940_v62  ;;  %v1509_v28 = vperm.slane %v2117_v30, 1 }
 0x157   : > { %v1065_v37 = vadd.s32 536870912, %v1064_v36  ;;  %vm1294_vm5 = vcmp.eq.s32.totalorder %v1292_v8, 0  ;;  %vm1293_vm8 = vcmp.lt.s32.totalorder %v1292_v8, 2  ;;  %vm1297_vm4 = vcmp.eq.s32.totalorder %v1292_v8, 2 }
 0x158   : > { %v942_v54 = vadd.f32 0.041655596, %v941_v46  ;;  %v949_v48 = vadd.f32 0.008332121, %v948_v58  ;;  %v1496_v8 = vperm.slane %v2117_v30, 0 }
 0x159   : > { %v2457_v60 = vshrl.u32 %v1065_v37, 30 }
 0x15a   : > { %v943_v52 = vmul.f32 %v942_v54, %v940_v62  ;;  %v950_v61 = vmul.f32 %v949_v48, %v940_v62 }
 0x15b   : > { %v1067_v0 = vshll.u32 %v2457_v60, 30 }
 0x15c   : > { %v944_v50 = vadd.f32 -0.4999988, %v943_v52  ;;  %v951_v56 = vadd.f32 -0.16666654, %v950_v61 }
 0x15d   : > { %v1068_v12 = vsub.s32 %v1064_v36, %v1067_v0 }
 0x15e   : > { %v945_v4 = vmul.f32 %v944_v50, %v940_v62  ;;  %v952_v14 = vmul.f32 %v951_v56, %v940_v62  ;;  %v1144_v56 = vperm.slane %v2126_v35, 0 }
 0x15f   : > { %vm1069_vm9 = vcmp.lt.s32.totalorder %v1068_v12, 0  ;;  %v1070_v3 = vsub.s32 0, %v1068_v12 }
 0x160   : > { %v946_v10 = vadd.f32 1.0, %v945_v4  ;;  %v953_v19 = vadd.f32 1.0, %v952_v14  ;;  %v1090_v4 = vsub.s32 4, %v2457_v60 }
 0x161   : > { %v1071_v2 = vsel %vm1069_vm9, %v1070_v3, %v1068_v12  ;;  %vm968_vm9 = vcmp.lt.s32.totalorder %v2255_v13, 0 }
 0x162   : > { %v954_v23 = vmul.f32 %v953_v19, %v938_v40  ;;  %v962_v63 = vxor.u32 2147483648, %v946_v10  ;;  %v1072_v39 = vclz %v1071_v2  ;;  %v1060_v40 = vadd.s32 %v1055_v7, %v1036_v43 }
 0x163   : > { %v2616_v19 = vand.u32 2147483647, %v2255_v13 }
 0x164   : > { %v959_v42 = vxor.u32 2147483648, %v954_v23  ;;  %v963_v20 = vsel %vm961_vm7, %v962_v63, %v954_v23  ;;  %v1696_v21 = vadd.s32 4294967294, %v1072_v39  ;;  %v1299_v45 = vsel %vm1297_vm4, %v962_v63, %v954_v23 }
 0x165   : > { %vm967_vm7 = vcmp.le.f32.partialorder %v2616_v19, 0.7853982  ;;  %v1091_v23 = vsel %vm968_vm9, %v1090_v4, %v2457_v60 }
 0x166   : > { %v960_v59 = vsel %vm958_vm14, %v946_v10, %v959_v42  ;;  %vm1697_vm3 = vcmp.lt.s32.totalorder %v1696_v21, 0  ;;  %v1296_v54 = vsel %vm1294_vm5, %v946_v10, %v959_v42  ;;  %v1093_v2 = vsel %vm967_vm7, 0, %v1091_v23 }
 0x167   : > { %v964_v44 = vsel %vm957_vm15, %v960_v59, %v963_v20  ;;  %v1075_v38 = vsel %vm1697_vm3, 0, %v1696_v21  ;;  %v1300_v7 = vsel %vm1293_vm8, %v1296_v54, %v1299_v45  ;;  %vm1516_vm14 = vcmask 61441  }
 0x168   : > { %v965_v57 = vsel %vm955_vm0, nan, %v964_v44  ;;  %v1076_v6 = vsub.s32 32, %v1075_v38  ;;  %v1077_v5 = vshll.u32 %v1068_v12, %v1075_v38  ;;  %v1080_v47 = vsub.s32 4294967266, %v1075_v38 }
 0x169   : > { %v1120_v18 = vmul.f32 %v965_v57, %v2217_v55  ;;  %v1301_v61 = vsel %vm955_vm0, nan, %v1300_v7  ;;  %v780_v44 = vperm.slane %v2227_v22, 0  ;;  %v1481_v57 = vperm.slane %v2126_v35, 1 }
 0x16a   : > { %v1078_v58 = vshrl.u32 %v1060_v40, %v1076_v6  ;;  %v1081_v9 = vadd.s32 127, %v1080_v47  ;;  %v1457_v11 = vmul.f32 %v1301_v61, %v2217_v55  ;;  %v1446_v40 = vadd.s32 3, %v1093_v2 }
 0x16b   : > { %v1124_v62 = vrot.slane %v1120_v18, 7  ;;  %v2618_v6 = vperm.slane %v2108_v27, 0  ;;  %v1497_v22 = vperm.slane %v2123_v34, 0  ;;  %v1510_v7 = vperm.slane %v2123_v34, 1 }
 0x16c   : > { %v1079_v48 = vor.u32 %v1078_v58, %v1077_v5  ;;  %v1082_v36 = vshll.u32 %v1081_v9, 23  ;;  %v1461_v14 = vrot.slane %v1457_v11, 7  ;;  %v2620_v9 = vperm.slane %v2105_v26, 0 }
 0x16d   : > { %v1128_v46 = vsel %vm548_vm1, 0.0, %v1124_v62  ;;  %v2617_v62 = vperm.slane %v2103_v25, 0  ;;  %v787_v30 = vsel %vm497_vm10, %v781_v41, %v780_v44  ;;  %v1110_v61 = vand.u32 3, %v1093_v2 }
 0x16e   : > { %v1130_v32 = vadd.f32 %v1128_v46, %v1120_v18  ;;  %v1083_v49 = vor.u32 4788187, %v1082_v36  ;;  %v1086_v52 = vcvt.s32.f32 %v1079_v48  ;;  %v1465_v15 = vsel %vm548_vm1, 0.0, %v1461_v14 }
 0x16f   : > { %v1467_v63 = vadd.f32 %v1465_v15, %v1457_v11  ;;  %v1498_v5 = vsel %vm497_vm10, %v2618_v6, %v2617_v62  ;;  %v2622_v48 = vperm.slane %v2120_v33, 0  ;;  %v1511_v33 = vsel %vm503_vm13, %v1509_v28, %v2149_v31 }
 0x170   : > { %v1134_v43 = vrot.slane %v1130_v32, 6  ;;  %v1084_v51 = vand.u32 2147483647, %v1083_v49  ;;  %v1499_v58 = vsel %vm499_vm11, %v2619_v1, %v1498_v5  ;;  %1712 = vst.msk [vmem:[%s2100_s10 + $0x27] sm:$0x1e] %vm1516_vm14, %v1511_v33  ;;  %v783_v11 = vperm.slane %v2237_v17, 0 }
 0x171   : > { %v1471_v42 = vrot.slane %v1467_v63, 6  ;;  %v1500_v27 = vsel %vm501_vm12, %v1496_v8, %v1499_v58  ;;  %vm1111_vm0 = vcmp.lt.s32.totalorder %v1110_v61, 2  ;;  %vm1112_vm3 = vcmp.eq.s32.totalorder %v1110_v61, 0 }
 0x172   : > { %v1138_v37 = vsel %vm587_vm2, 0.0, %v1134_v43  ;;  %v1087_v10 = vmul.f32 %v1086_v52, %v1084_v51  ;;  %1710 = vst.msk [vmem:[%s2100_s10 + $0x20] sm:$0xf] %vm1484_vm6, %v1500_v27  ;;  %vm1109_vm8 = vweird.f32 %v2255_v13 }
 0x173   : > { %v1140_v50 = vadd.f32 %v1138_v37, %v1130_v32  ;;  %v1475_v59 = vsel %vm587_vm2, 0.0, %v1471_v42  ;;  %v2621_v32 = vperm.slane %v2114_v29, 0  ;;  %v782_v29 = vperm.slane %v2234_v16, 0 }
 0x174   : > { %v1088_v55 = vxor.u32 2147483648, %v1087_v10  ;;  %v1477_v21 = vadd.f32 %v1475_v59, %v1467_v63  ;;  %v1447_v37 = vand.u32 3, %v1446_v40  ;;  %v1512_v16 = vsel %vm503_vm13, %v1510_v7, %v2157_v53 }
 0x175   : > { %v1142_v0 = vmul.f32 0.1, %v1140_v50  ;;  %v1501_v54 = vsel %vm497_vm10, %v2621_v32, %v2620_v9  ;;  %1713 = vst.msk [vmem:[%s2100_s10 + $0x2b] sm:$0x1e] %vm1516_vm14, %v1512_v16  ;;  %v788_v34 = vsel %vm499_vm11, %v782_v29, %v787_v30  ;;  %vm1115_vm10 = vcmp.eq.s32.totalorder %v1110_v61, 2 }
 0x176   : > { %v1089_v3 = vsel %vm968_vm9, %v1088_v55, %v1087_v10  ;;  %v1479_v38 = vmul.f32 0.1, %v1477_v21  ;;  %v1502_v36 = vsel %vm499_vm11, %v2622_v48, %v1501_v54  ;;  %vm1452_vm15 = vcmp.eq.s32.totalorder %v1447_v37, 2 }
 0x177   : > { %v1145_v12 = vadd.f32 %v1144_v56, %v1142_v0  ;;  %v1092_v20 = vsel %vm967_vm7, %v2255_v13, %v1089_v3  ;;  %v1503_v26 = vsel %vm501_vm12, %v1497_v22, %v1502_v36  ;;  %v789_v14 = vsel %vm501_vm12, %v783_v11, %v788_v34 }
 0x178   : > { %v1094_v39 = vmul.f32 %v1092_v20, %v1092_v20  ;;  %v1482_v25 = vadd.f32 %v1481_v57, %v1479_v38  ;;  %1711 = vst.msk [vmem:[%s2100_s10 + $0x24] sm:$0xf] %vm1484_vm6, %v1503_v26  ;;  %vm1449_vm5 = vcmp.eq.s32.totalorder %v1447_v37, 0  ;;  %vm1448_vm13 = vcmp.lt.s32.totalorder %v1447_v37, 2 }
 0x179   : > { %1485 = vst.msk [vmem:[%s2100_s10] sm:$0xf] %vm1484_vm6, %v1145_v12  ;;  %v793_v15 = vsub.f32 %v2447_v24, %v789_v14 }
 0x17a   : > { %v1095_v18 = vmul.f32 -0.001358992, %v1094_v39  ;;  %v1102_v60 = vmul.f32 -0.00019511016, %v1094_v39  ;;  %1704 = vst.msk [vmem:[%s2100_s10 + $0x8] sm:$0xf] %vm1484_vm6, %v1482_v25 }
 0x17c   : > { %v1096_v47 = vadd.f32 0.041655596, %v1095_v18  ;;  %v1103_v46 = vadd.f32 0.008332121, %v1102_v60 }
 0x17e   : > { %v1097_v45 = vmul.f32 %v1096_v47, %v1094_v39  ;;  %v1104_v43 = vmul.f32 %v1103_v46, %v1094_v39 }
 0x180   : > { %v1098_v49 = vadd.f32 -0.4999988, %v1097_v45  ;;  %v1105_v52 = vadd.f32 -0.16666654, %v1104_v43 }
 0x182   : > { %v1099_v50 = vmul.f32 %v1098_v49, %v1094_v39  ;;  %v1106_v51 = vmul.f32 %v1105_v52, %v1094_v39 }
 0x184   : > { %v1100_v31 = vadd.f32 1.0, %v1099_v50  ;;  %v1107_v4 = vadd.f32 1.0, %v1106_v51 }
 0x186   : > { %v1108_v0 = vmul.f32 %v1107_v4, %v1092_v20  ;;  %v1116_v10 = vxor.u32 2147483648, %v1100_v31 }
 0x188   : > { %v1113_v53 = vxor.u32 2147483648, %v1108_v0  ;;  %v1117_v19 = vsel %vm1115_vm10, %v1116_v10, %v1108_v0  ;;  %v1454_v17 = vsel %vm1452_vm15, %v1116_v10, %v1108_v0 }
 0x18a   : > { %v1114_v12 = vsel %vm1112_vm3, %v1100_v31, %v1113_v53  ;;  %v1451_v55 = vsel %vm1449_vm5, %v1100_v31, %v1113_v53 }
 0x18b   : > { %v1118_v23 = vsel %vm1111_vm0, %v1114_v12, %v1117_v19  ;;  %v1455_v63 = vsel %vm1448_vm13, %v1451_v55, %v1454_v17 }
 0x18c   : > { %v1119_v3 = vsel %vm1109_vm8, nan, %v1118_v23  ;;  %v1456_v42 = vsel %vm1109_vm8, nan, %v1455_v63 }
 0x18d   : > { %v1121_v2 = vmul.f32 %v1119_v3, %v793_v15  ;;  %v1458_v20 = vmul.f32 %v1456_v42, %v793_v15 }
 0x18f   : > { %v1125_v39 = vrot.slane %v1121_v2, 7  ;;  %v1462_v59 = vrot.slane %v1458_v20, 7 }
 0x191   : > { %v1129_v44 = vsel %vm548_vm1, 0.0, %v1125_v39  ;;  %v1466_v21 = vsel %vm548_vm1, 0.0, %v1462_v59 }
 0x192   : > { %v1131_v41 = vadd.f32 %v1129_v44, %v1121_v2  ;;  %v1468_v24 = vadd.f32 %v1466_v21, %v1458_v20 }
 0x194   : > { %v1135_v18 = vrot.slane %v1131_v41, 6  ;;  %v1472_v13 = vrot.slane %v1468_v24, 6 }
 0x196   : > { %v1139_v60 = vsel %vm587_vm2, 0.0, %v1135_v18  ;;  %v1476_v40 = vsel %vm587_vm2, 0.0, %v1472_v13 }
 0x197   : > { %v1141_v38 = vadd.f32 %v1139_v60, %v1131_v41  ;;  %v1478_v8 = vadd.f32 %v1476_v40, %v1468_v24 }
 0x199   : > { %v1143_v62 = vmul.f32 0.1, %v1141_v38  ;;  %v1480_v6 = vmul.f32 0.1, %v1478_v8 }
 0x19b   : > { %v1146_v5 = vadd.f32 %v1144_v56, %v1143_v62  ;;  %v1483_v22 = vadd.f32 %v1481_v57, %v1480_v6 }
 0x19d   : > { %1486 = vst.msk [vmem:[%s2100_s10 + $0x4] sm:$0xf] %vm1484_vm6, %v1146_v5 }
 0x19e   : > { %1705 = vst.msk [vmem:[%s2100_s10 + $0xc] sm:$0xf] %vm1484_vm6, %v1483_v22 }
 0x19f PF: > { %s1731_s15 = smul.u32 48, %s1894_s16  ;;  %s1532_s4 = sshll.u32 %s2100_s10, 4  ;;  %s1533_s4 = int_to_ptr.vmem [resolvable:$true] %s1532_s4 }
 0x1a0   : > { %s1520_s27 = scalar_lea.sflag [#allocation4], %s210_s29  ;;  %s1832_s16 = scalar_lea.hbm %s2590_s3, 96 }
 0x1a1   : > { %s1531_s21 = scalar_lea.hbm %s2590_s3, %s1731_s15 }
 0x1a2   : > { %s1534_s26 = sshll.u32 %s1531_s21, 4  ;;  %s1535_s26 = int_to_ptr.hbm [resolvable:$true] %s1534_s26 }
 0x1a3   : > { %s1826_s5 = sshra.s32 %s1535_s26, 4  ;;  %s1827_s5 = int_to_ptr.hbm [resolvable:$true] %s1826_s5 }
 0x1a4   : > { %s1828_s30 = scalar_lea.hbm %s1827_s5, 48  ;;  %p1833_p5 = scmp.lt.s32.totalorder %s1827_s5, %s2590_s3 }
 0x1a5   : > { %p1829_p1 = scmp.ne.s32.totalorder %s1827_s5, %s1828_s30  ;;  %p1834_p6 = scmp.lt.s32.totalorder %s1832_s16, %s1828_s30 }
 0x1a7   : > { %p1830_p2 = pnand %p1829_p1, %p1986_p3  ;;  %p1835_p7 = por %p1834_p6, %p1833_p5 }
 0x1a9   : > { %p1831_p4 = pneg %p1830_p2 }
 0x1ab   : > { %p1836_p8 = pnand %p1835_p7, %p1831_p4 }
 0x1ad   : > { %1839 = shalt.err (!%p1836_p8)
}
 0x1ae   : > { %s1915_s29 = smov 64   ;;  %s1916_s10 = smov 4  }
 0x1af   : > { %1732 = dma.vmem_to_hbm [thread:$0]  (%p1986_p3), %s1533_s4, 768, %s1535_s26, %s1520_s27, %s1915_s29, %s1915_s29, %s1916_s10  }
 0x1b0 PF: > { %p1738_p10 = scmp.ge.s32.totalorder %s1906_s19, 2  ;;  %s1549_s15 = sand.u32 1, %s1878_s12  }
 0x1b1   : > { %s1550_s11 = scalar_lea.sflag [#allocation4], %s1549_s15 }
 0x1b2   : > { %p1735_p11 = pnand %p1738_p10, %p1996_p9 }
 0x1b4   : > { %p1736_p12 = pneg %p1735_p11 }
 0x1b6   : > { %1873 = dma.done.wait (%p1736_p12), %s1550_s11, 768  }
 0x1b7   : > { %1875 = vsyncadd (%p1736_p12), %s1550_s11, 4294966528  ;;  %s16_s19 = sadd.s32 1, %s1906_s19   ;;  %s2623_s12 = smov %s1882_s13 }
 0x1b8   : > { %p13_p13 = scmp.ge.s32.totalorder %s16_s19, 6   ;;  %s2624_s13 = smov %s1886_s14 }
 0x1b9   : > { %s2625_s14 = smov %s2004_s28  ;;  %s2626_s15 = smov %s1898_s17 }
 0x1ba   : > { %s2627_s16 = smov %s1902_s18  ;;  %s2628_s17 = smov %s2631_s22 }
 0x1bb   : > { %s2629_s18 = smov %s2635_s23  ;;  %15 = sbr.rel (!%p13_p13) target bundleno = 5 (0x5), region = 83 }
 0x1c0   :  { %1556 = vsyncpa [#allocation4], 1 }
 0x1c1   :  { %1558 = vsyncpa [#allocation4 + $0x1], 1 }

</bundles_post_ra>
